<compile_context>
chip_gen: v7x
topology: tpu7x:2x2x1
jax: 0.10.0
libtpu: 0.0.40
codegen_flags: <defaults>
</compile_context>

<pallas_src>
import jax
import jax.numpy as jnp
from jax.experimental import pallas as pl
from jax.experimental.pallas import tpu as pltpu


def _disc_kernel(xT_ref, w1_ref, b1_ref, w2_ref, b2_ref,
                 w3_ref, b3_ref, w4_ref, b4_ref, o_ref):
    xT = xT_ref[...]                         # (3, bt)  f32, batch on lanes
    w1 = w1_ref[...]                         # (256, 3) f32

    # ---- Layer 1: Linear(3, 256) + ReLU.  K=3 -> 3 VPU broadcast-FMAs.
    h = (w1[:, 0:1] * xT[0:1, :]
         + w1[:, 1:2] * xT[1:2, :]
         + w1[:, 2:3] * xT[2:3, :]
         + b1_ref[...])                      # (256, bt) f32
    h = jnp.maximum(h, 0.0)
    # Dropout(0.3) -> identity in eval mode.

    # ---- Layer 2: Linear(256, 128) + ReLU.  bf16 MXU operands, f32 accumulate.
    h = jnp.dot(w2_ref[...], h.astype(jnp.bfloat16),
                preferred_element_type=jnp.float32) + b2_ref[...]
    h = jnp.maximum(h, 0.0)                  # (128, bt) f32

    # ---- Layer 3: Linear(128, 64) + ReLU.  bf16 MXU operands, f32 accumulate.
    h = jnp.dot(w3_ref[...], h.astype(jnp.bfloat16),
                preferred_element_type=jnp.float32) + b3_ref[...]
    h = jnp.maximum(h, 0.0)                  # (64, bt) f32

    # ---- Layer 4: Linear(64, 1) off the MXU: VPU multiply + sublane reduce.
    # w4_ref is pre-transposed to a (64, 1) column in the wrapper.
    logits = jnp.sum(w4_ref[...] * h, axis=0, keepdims=True) + b4_ref[...]  # (1, bt)

    # ---- Sigmoid on the EUP: exp + approximate reciprocal (both EUP slots).
    o_ref[...] = pl.reciprocal(1.0 + jnp.exp(-logits), approx=True).astype(o_ref.dtype)


def _round_up(n, m):
    return -(-n // m) * m


def _choose_tiling(B, batch_tile):
    """Lane-multiple tiles; >=2 (and even) tiles whenever there is enough work,
    so v7x's two TensorCores both get a balanced share via dimension_semantics."""
    B_pad = _round_up(B, 128)                # lane-dense stores, bucketed compiles
    if B_pad <= 128:
        return 128, 1                        # too small to split across cores
    num_tiles = 2 * pl.cdiv(B_pad, 2 * batch_tile)        # even, >= 2
    bt = _round_up(pl.cdiv(B_pad, num_tiles), 128)         # <= batch_tile, 128-mult
    return bt, num_tiles


def discriminator_forward(x, params, *, batch_tile=4096):
    """x: (B, 3) float32. params: torch-layout weights/biases. Returns (B, 1)."""
    B, F = x.shape
    assert F == 3
    assert batch_tile % 128 == 0 and batch_tile >= 128
    x = x.astype(jnp.float32)

    bt, num_tiles = _choose_tiling(B, batch_tile)
    Bp = bt * num_tiles

    # Pad + transpose in one expression (XLA fuses into a single HBM pass);
    # batch goes on the lane axis so output tiles are lane-dense.
    xT = jnp.pad(x, ((0, Bp - B), (0, 0))).T                # (3, Bp)

    w1, b1 = params["w1"], params["b1"]                     # (256, 3),  (256, 1)  f32
    # bf16 MXU operands for layers 2-3 (f32 accumulation inside the kernel).
    w2 = params["w2"].astype(jnp.bfloat16)                  # (128, 256) bf16
    b2 = params["b2"]                                       # (128, 1)   f32
    w3 = params["w3"].astype(jnp.bfloat16)                  # (64, 128)  bf16
    b3 = params["b3"]                                       # (64, 1)    f32
    # Layer 4 runs on VPU/XLU -> keep f32 and pre-transpose to a (64, 1) column
    # so the kernel needs no cross-lane reshape.
    w4c = params["w4"].T                                    # (64, 1)    f32
    b4 = params["b4"]                                       # (1, 1)     f32

    def resident(a):
        # Full array + constant index_map -> stays VMEM-resident across tiles.
        return pl.BlockSpec(a.shape, lambda i: (0, 0))

    flops = 2 * Bp * (3 * 256 + 256 * 128 + 128 * 64 + 64 * 1)
    bytes_accessed = (
        4 * (Bp * 3 + Bp)                                   # x^T in, sigmoid out
        + 4 * int(w1.size + b1.size + b2.size + b3.size + w4c.size + b4.size)
        + 2 * int(w2.size + w3.size))                       # bf16 weights

    out = pl.pallas_call(
        _disc_kernel,
        out_shape=jax.ShapeDtypeStruct((1, Bp), jnp.float32),
        grid_spec=pltpu.PrefetchScalarGridSpec(
            num_scalar_prefetch=0,
            grid=(num_tiles,),
            in_specs=[
                pl.BlockSpec((3, bt), lambda i: (0, i)),    # x^T batch tile
                resident(w1), resident(b1),
                resident(w2), resident(b2),
                resident(w3), resident(b3),
                resident(w4c), resident(b4),
            ],
            out_specs=pl.BlockSpec((1, bt), lambda i: (0, i)),
        ),
        compiler_params=pltpu.CompilerParams(
            dimension_semantics=("parallel",),   # v7x: shard batch tiles across 2 TCs
        ),
        cost_estimate=pl.CostEstimate(
            flops=int(flops),
            transcendentals=int(2 * Bp),         # exp + reciprocal per output
            bytes_accessed=int(bytes_accessed),
        ),
    )(xT, w1, b1, w2, b2, w3, b3, w4c, b4)

    return out[:, :B].reshape(B, 1)


def init_params(key):
    """PyTorch nn.Linear default init; W stored as (out, in), b as (out, 1)."""
    def linear(key, fan_in, fan_out):
        kw, kb = jax.random.split(key)
        bound = float(fan_in) ** -0.5
        w = jax.random.uniform(kw, (fan_out, fan_in), jnp.float32, -bound, bound)
        b = jax.random.uniform(kb, (fan_out, 1), jnp.float32, -bound, bound)
        return w, b

    k1, k2, k3, k4 = jax.random.split(key, 4)
    w1, b1 = linear(k1, 3, 256)
    w2, b2 = linear(k2, 256, 128)
    w3, b3 = linear(k3, 128, 64)
    w4, b4 = linear(k4, 64, 1)
    return dict(w1=w1, b1=b1, w2=w2, b2=b2, w3=w3, b3=b3, w4=w4, b4=b4)


def _reference(x, p):
    """Plain JAX eval-mode forward (dropout = identity)."""
    h = jnp.maximum(x @ p["w1"].T + p["b1"].T, 0.0)
    h = jnp.maximum(h @ p["w2"].T + p["b2"].T, 0.0)
    h = jnp.maximum(h @ p["w3"].T + p["b3"].T, 0.0)
    return jax.nn.sigmoid(h @ p["w4"].T + p["b4"].T)


if __name__ == "__main__":
    key = jax.random.PRNGKey(0)
    k_params, k_x = jax.random.split(key)
    params = init_params(k_params)

    # Tolerance note: the kernel uses bf16 MXU operands (f32 accumulation) for
    # layers 2-3 and an approximate EUP reciprocal in the sigmoid, while the
    # reference runs default-precision f32 matmuls.  Sigmoid outputs live in
    # [0, 1], so 2e-2 absolute comfortably covers the bf16 rounding while still
    # catching any real bug.

    # Multi-tile path: 256 rows -> two 128-wide tiles (both v7x TCs get work).
    B = 256
    x = jax.random.normal(k_x, (B, 3), dtype=jnp.float32)
    out = jax.block_until_ready(discriminator_forward(x, params))
    assert out.shape == (B, 1)
    ref = _reference(x, params)
    assert jnp.allclose(out, ref, atol=2e-2, rtol=2e-2), \
        float(jnp.max(jnp.abs(out - ref)))

    # Ragged batch (pad-and-slice path): 1000 rows -> two 512-wide tiles.
    B2 = 1000
    x2 = jax.random.normal(jax.random.PRNGKey(1), (B2, 3), dtype=jnp.float32)
    out2 = jax.block_until_ready(discriminator_forward(x2, params))
    assert out2.shape == (B2, 1)
    assert jnp.allclose(out2, _reference(x2, params), atol=2e-2, rtol=2e-2)

    # Tiny batch: single 128-wide tile (still lane-dense, no masked stores).
    B3 = 64
    x3 = jax.random.normal(jax.random.PRNGKey(2), (B3, 3), dtype=jnp.float32)
    out3 = jax.block_until_ready(discriminator_forward(x3, params))
    assert out3.shape == (B3, 1)
    assert jnp.allclose(out3, _reference(x3, params), atol=2e-2, rtol=2e-2)

    print("KERNEL_OK")
</pallas_src>

<mosaic_0001>
module attributes {stable_mosaic.version = 11 : i64} {
  func.func @_disc_kernel(%arg0: i32, %arg1: memref<3x128xf32, #tpu.memory_space<vmem>>, %arg2: memref<256x3xf32, #tpu.memory_space<vmem>>, %arg3: memref<256x1xf32, #tpu.memory_space<vmem>>, %arg4: memref<128x256xbf16, #tpu.memory_space<vmem>>, %arg5: memref<128x1xf32, #tpu.memory_space<vmem>>, %arg6: memref<64x128xbf16, #tpu.memory_space<vmem>>, %arg7: memref<64x1xf32, #tpu.memory_space<vmem>>, %arg8: memref<64x1xf32, #tpu.memory_space<vmem>>, %arg9: memref<1x1xf32, #tpu.memory_space<vmem>>, %arg10: memref<1x128xf32, #tpu.memory_space<vmem>>) attributes {dimension_semantics = [#tpu.dimension_semantics<parallel>], iteration_bounds = array<i64: 2>, scalar_prefetch = 0 : i64, scratch_operands = 0 : i64, tpu.core_type = #tpu.core_type<tc>, window_params = [{transform_indices = @transform_0, window_bounds = array<i64: 3, 128>}, {pipeline_mode = #tpu.pipeline_mode<synchronous>, transform_indices = @transform_1, window_bounds = array<i64: 256, 3>}, {pipeline_mode = #tpu.pipeline_mode<synchronous>, transform_indices = @transform_2, window_bounds = array<i64: 256, 1>}, {pipeline_mode = #tpu.pipeline_mode<synchronous>, transform_indices = @transform_3, window_bounds = array<i64: 128, 256>}, {pipeline_mode = #tpu.pipeline_mode<synchronous>, transform_indices = @transform_4, window_bounds = array<i64: 128, 1>}, {pipeline_mode = #tpu.pipeline_mode<synchronous>, transform_indices = @transform_5, window_bounds = array<i64: 64, 128>}, {pipeline_mode = #tpu.pipeline_mode<synchronous>, transform_indices = @transform_6, window_bounds = array<i64: 64, 1>}, {pipeline_mode = #tpu.pipeline_mode<synchronous>, transform_indices = @transform_7, window_bounds = array<i64: 64, 1>}, {pipeline_mode = #tpu.pipeline_mode<synchronous>, transform_indices = @transform_8, window_bounds = array<i64: 1, 1>}, {transform_indices = @transform_9, window_bounds = array<i64: 1, 128>}]} {
    %c0 = arith.constant 0 : index
    %c0_0 = arith.constant 0 : index
    %0 = vector.load %arg1[%c0, %c0_0] : memref<3x128xf32, #tpu.memory_space<vmem>>, vector<3x128xf32>
    %c0_1 = arith.constant 0 : index
    %c0_2 = arith.constant 0 : index
    %1 = vector.load %arg2[%c0_1, %c0_2] : memref<256x3xf32, #tpu.memory_space<vmem>>, vector<256x3xf32>
    %2 = vector.extract_strided_slice %1 {offsets = [0, 0], sizes = [256, 1], strides = [1, 1]} : vector<256x3xf32> to vector<256x1xf32>
    %3 = vector.extract_strided_slice %0 {offsets = [0, 0], sizes = [1, 128], strides = [1, 1]} : vector<3x128xf32> to vector<1x128xf32>
    %4 = vector.broadcast %2 : vector<256x1xf32> to vector<256x128xf32>
    %5 = vector.broadcast %3 : vector<1x128xf32> to vector<256x128xf32>
    %6 = arith.mulf %4, %5 : vector<256x128xf32>
    %7 = vector.extract_strided_slice %1 {offsets = [0, 1], sizes = [256, 1], strides = [1, 1]} : vector<256x3xf32> to vector<256x1xf32>
    %8 = vector.extract_strided_slice %0 {offsets = [1, 0], sizes = [1, 128], strides = [1, 1]} : vector<3x128xf32> to vector<1x128xf32>
    %9 = vector.broadcast %7 : vector<256x1xf32> to vector<256x128xf32>
    %10 = vector.broadcast %8 : vector<1x128xf32> to vector<256x128xf32>
    %11 = arith.mulf %9, %10 : vector<256x128xf32>
    %12 = arith.addf %6, %11 : vector<256x128xf32>
    %13 = vector.extract_strided_slice %1 {offsets = [0, 2], sizes = [256, 1], strides = [1, 1]} : vector<256x3xf32> to vector<256x1xf32>
    %14 = vector.extract_strided_slice %0 {offsets = [2, 0], sizes = [1, 128], strides = [1, 1]} : vector<3x128xf32> to vector<1x128xf32>
    %15 = vector.broadcast %13 : vector<256x1xf32> to vector<256x128xf32>
    %16 = vector.broadcast %14 : vector<1x128xf32> to vector<256x128xf32>
    %17 = arith.mulf %15, %16 : vector<256x128xf32>
    %18 = arith.addf %12, %17 : vector<256x128xf32>
    %c0_3 = arith.constant 0 : index
    %c0_4 = arith.constant 0 : index
    %19 = vector.load %arg3[%c0_3, %c0_4] : memref<256x1xf32, #tpu.memory_space<vmem>>, vector<256x1xf32>
    %20 = vector.broadcast %19 : vector<256x1xf32> to vector<256x128xf32>
    %21 = arith.addf %18, %20 : vector<256x128xf32>
    %cst = arith.constant 0.000000e+00 : f32
    %22 = vector.broadcast %cst : f32 to vector<256x128xf32>
    %23 = arith.maximumf %21, %22 : vector<256x128xf32>
    %c0_5 = arith.constant 0 : index
    %c0_6 = arith.constant 0 : index
    %24 = vector.load %arg4[%c0_5, %c0_6] : memref<128x256xbf16, #tpu.memory_space<vmem>>, vector<128x256xbf16>
    %25 = arith.truncf %23 : vector<256x128xf32> to vector<256x128xbf16>
    %cst_7 = arith.constant dense<0.000000e+00> : vector<128x128xf32>
    %26 = tpu.matmul %24, %25, %cst_7 {dimension_numbers = #tpu.dot_dimension_numbers<[1], [0], [0], [1], [0, 0, 1, 1], [], []>} : vector<128x256xbf16>, vector<256x128xbf16>, vector<128x128xf32> -> vector<128x128xf32>
    %c0_8 = arith.constant 0 : index
    %c0_9 = arith.constant 0 : index
    %27 = vector.load %arg5[%c0_8, %c0_9] : memref<128x1xf32, #tpu.memory_space<vmem>>, vector<128x1xf32>
    %28 = vector.broadcast %27 : vector<128x1xf32> to vector<128x128xf32>
    %29 = arith.addf %26, %28 : vector<128x128xf32>
    %cst_10 = arith.constant 0.000000e+00 : f32
    %30 = vector.broadcast %cst_10 : f32 to vector<128x128xf32>
    %31 = arith.maximumf %29, %30 : vector<128x128xf32>
    %c0_11 = arith.constant 0 : index
    %c0_12 = arith.constant 0 : index
    %32 = vector.load %arg6[%c0_11, %c0_12] : memref<64x128xbf16, #tpu.memory_space<vmem>>, vector<64x128xbf16>
    %33 = arith.truncf %31 : vector<128x128xf32> to vector<128x128xbf16>
    %cst_13 = arith.constant dense<0.000000e+00> : vector<64x128xf32>
    %34 = tpu.matmul %32, %33, %cst_13 {dimension_numbers = #tpu.dot_dimension_numbers<[1], [0], [0], [1], [0, 0, 1, 1], [], []>} : vector<64x128xbf16>, vector<128x128xbf16>, vector<64x128xf32> -> vector<64x128xf32>
    %c0_14 = arith.constant 0 : index
    %c0_15 = arith.constant 0 : index
    %35 = vector.load %arg7[%c0_14, %c0_15] : memref<64x1xf32, #tpu.memory_space<vmem>>, vector<64x1xf32>
    %36 = vector.broadcast %35 : vector<64x1xf32> to vector<64x128xf32>
    %37 = arith.addf %34, %36 : vector<64x128xf32>
    %cst_16 = arith.constant 0.000000e+00 : f32
    %38 = vector.broadcast %cst_16 : f32 to vector<64x128xf32>
    %39 = arith.maximumf %37, %38 : vector<64x128xf32>
    %c0_17 = arith.constant 0 : index
    %c0_18 = arith.constant 0 : index
    %40 = vector.load %arg8[%c0_17, %c0_18] : memref<64x1xf32, #tpu.memory_space<vmem>>, vector<64x1xf32>
    %41 = vector.broadcast %40 : vector<64x1xf32> to vector<64x128xf32>
    %42 = arith.mulf %41, %39 : vector<64x128xf32>
    %cst_19 = arith.constant dense<0.000000e+00> : vector<128xf32>
    %43 = vector.multi_reduction <add>, %42, %cst_19 [0] : vector<64x128xf32> to vector<128xf32>
    %44 = vector.shape_cast %43 : vector<128xf32> to vector<1x128xf32>
    %c0_20 = arith.constant 0 : index
    %c0_21 = arith.constant 0 : index
    %45 = vector.load %arg9[%c0_20, %c0_21] : memref<1x1xf32, #tpu.memory_space<vmem>>, vector<1x1xf32>
    %46 = vector.broadcast %45 : vector<1x1xf32> to vector<1x128xf32>
    %47 = arith.addf %44, %46 : vector<1x128xf32>
    %cst_22 = arith.constant 0.000000e+00 : f32
    %48 = vector.broadcast %cst_22 : f32 to vector<1x128xf32>
    %49 = arith.subf %48, %47 : vector<1x128xf32>
    %50 = math.exp %49 : vector<1x128xf32>
    %cst_23 = arith.constant 1.000000e+00 : f32
    %51 = vector.broadcast %cst_23 : f32 to vector<1x128xf32>
    %52 = arith.addf %51, %50 : vector<1x128xf32>
    %53 = tpu.reciprocal %52 {approx = true} : vector<1x128xf32> -> vector<1x128xf32>
    %c0_24 = arith.constant 0 : index
    %c0_25 = arith.constant 0 : index
    %54 = vector.load %arg10[%c0_24, %c0_25] : memref<1x128xf32, #tpu.memory_space<vmem>>, vector<1x128xf32>
    tpu.vector_store %arg10[%c0_24, %c0_25], %53 {strides = array<i32>} : memref<1x128xf32, #tpu.memory_space<vmem>>, vector<1x128xf32>,
    return
  }
  func.func @transform_0(%arg0: i32) -> (i32, i32) {
    %c0_i32 = arith.constant 0 : i32
    %c0_i32_0 = arith.constant 0 : i32
    return %c0_i32, %arg0 : i32, i32
  }
  func.func @transform_1(%arg0: i32) -> (i32, i32) {
    %c0_i32 = arith.constant 0 : i32
    %c0_i32_0 = arith.constant 0 : i32
    %c0_i32_1 = arith.constant 0 : i32
    return %c0_i32, %c0_i32_0 : i32, i32
  }
  func.func @transform_2(%arg0: i32) -> (i32, i32) {
    %c0_i32 = arith.constant 0 : i32
    %c0_i32_0 = arith.constant 0 : i32
    %c0_i32_1 = arith.constant 0 : i32
    return %c0_i32, %c0_i32_0 : i32, i32
  }
  func.func @transform_3(%arg0: i32) -> (i32, i32) {
    %c0_i32 = arith.constant 0 : i32
    %c0_i32_0 = arith.constant 0 : i32
    %c0_i32_1 = arith.constant 0 : i32
    return %c0_i32, %c0_i32_0 : i32, i32
  }
  func.func @transform_4(%arg0: i32) -> (i32, i32) {
    %c0_i32 = arith.constant 0 : i32
    %c0_i32_0 = arith.constant 0 : i32
    %c0_i32_1 = arith.constant 0 : i32
    return %c0_i32, %c0_i32_0 : i32, i32
  }
  func.func @transform_5(%arg0: i32) -> (i32, i32) {
    %c0_i32 = arith.constant 0 : i32
    %c0_i32_0 = arith.constant 0 : i32
    %c0_i32_1 = arith.constant 0 : i32
    return %c0_i32, %c0_i32_0 : i32, i32
  }
  func.func @transform_6(%arg0: i32) -> (i32, i32) {
    %c0_i32 = arith.constant 0 : i32
    %c0_i32_0 = arith.constant 0 : i32
    %c0_i32_1 = arith.constant 0 : i32
    return %c0_i32, %c0_i32_0 : i32, i32
  }
  func.func @transform_7(%arg0: i32) -> (i32, i32) {
    %c0_i32 = arith.constant 0 : i32
    %c0_i32_0 = arith.constant 0 : i32
    %c0_i32_1 = arith.constant 0 : i32
    return %c0_i32, %c0_i32_0 : i32, i32
  }
  func.func @transform_8(%arg0: i32) -> (i32, i32) {
    %c0_i32 = arith.constant 0 : i32
    %c0_i32_0 = arith.constant 0 : i32
    %c0_i32_1 = arith.constant 0 : i32
    return %c0_i32, %c0_i32_0 : i32, i32
  }
  func.func @transform_9(%arg0: i32) -> (i32, i32) {
    %c0_i32 = arith.constant 0 : i32
    %c0_i32_0 = arith.constant 0 : i32
    return %c0_i32, %arg0 : i32, i32
  }
}

</mosaic_0001>

<bundles_post_ra>
// kernel: tpu_custom_call.1
= control target key start
LH: loop header
LB: loop body
LE: loop exit
PB: predicated region body
PF: predicated region fallthrough
CT: control target
= control target key end

     0   :  { %s3131_s0 = inlined_call_operand.vmem [shape: f32[3,256], index: 0, kind: input, shape index: {}]   ;;  %s3132_s1 = inlined_call_operand.vmem [shape: f32[256,3], index: 1, kind: input, shape index: {}]   ;;  %s3133_s2 = inlined_call_operand.vmem [shape: f32[256,1], index: 2, kind: input, shape index: {}]   ;;  %s3134_s3 = inlined_call_operand.vmem [shape: bf16[128,256], index: 3, kind: input, shape index: {}]   ;;  %s3135_s4 = inlined_call_operand.vmem [shape: f32[128,1], index: 4, kind: input, shape index: {}]   ;;  %s3136_s5 = inlined_call_operand.vmem [shape: bf16[64,128], index: 5, kind: input, shape index: {}]   ;;  %s3137_s6 = inlined_call_operand.vmem [shape: f32[64,1], index: 6, kind: input, shape index: {}]   ;;  %s3138_s7 = inlined_call_operand.vmem [shape: f32[64,1], index: 7, kind: input, shape index: {}]   ;;  %s3139_s8 = inlined_call_operand.<no memory space> [shape: f32[1,1], index: 8, kind: input, shape index: {}]   ;;  %s3140_s9 = inlined_call_operand.hbm [shape: f32[1,256], index: 9, kind: output, shape index: {}]  }
   0x1   :  { %v14_v0 = vstv %s3139_s8 }
   0x2   :  { %15 = vst [vmem:[#allocation2] sm:$0x1] %v14_v0 }
   0x3   :  { %16 = vsyncpa [#allocation4], 0 }
   0x4   :  { %18 = vsyncpa [#allocation4 + $0x1], 0  ;;  %s2223_s11 = smov 0   ;;  %s2225_s12 = smov 0  }
   0x5   :  { %s2227_s13 = smov 0   ;;  %s2229_s14 = smov 0  }
   0x6 LB: > { %s2244_s8 = sadd.s32 4294967295, %s2164_s14   ;;  %s1843_s15 = sadd.s32 4294967294, %s2164_s14   ;;  %s2164_s14 = sphi %s2229_s14, %s3146_s14   ;;  %s2160_s13 = sphi %s2227_s13, %s3145_s13   ;;  %s2156_s12 = sphi %s2225_s12, %s3144_s12   ;;  %s2152_s11 = sphi %s2223_s11, %s3143_s11  }
   0x7   : > { %s2248_s16 = sadd.s32 1, %s2164_s14   ;;  %s225_s17 = sadd.s32 1, %s2160_s13 }
   0x8   : > { %s222_s18 = ssub.s32 %s2164_s14, %s2248_s16  ;;  %p235_p0 = scmp.ne.s32.totalorder %s2160_s13, %s2156_s12 }
   0x9   : > { %p223_p1 = scmp.eq.s32.totalorder %s222_s18, 0  ;;  %p236_p2 = scmp.eq.s32.totalorder %s2244_s8, 1 }
   0xa   : > { %p241_p3 = scmp.ne.s32.totalorder %s2156_s12, %s2152_s11  ;;  %p242_p4 = scmp.eq.s32.totalorder %s1843_s15, 1 }
   0xb   : > { %s2259_s19 = scalar_select %p223_p1, %s2160_s13, %s225_s17  }
   0xc   : > { %p2261_p5 = por %p236_p2, %p235_p0  ;;  %p2265_p6 = por %p242_p4, %p241_p3 }
   0xd   : > { %p1846_p7 = scmp.ge.s32.totalorder %s2164_s14, 1  ;;  %p291_p8 = scmp.lt.s32.totalorder %s2164_s14, 3 }
   0xf   : > { %p292_p9 = pnand %p1846_p7, %p291_p8 }
  0x10   : > { %v2274_v1 = vld [vmem:[%s3132_s1 + $0x80] sm:$0xff] (!%p292_p9)  ;;  %v2166_v3 = vmov (!%p292_p9), 1   ;;  %v348_v4 = vld [vmem:[%s3132_s1 + $0x88] sm:$0xff] (!%p292_p9)  ;;  %v350_v5 = vld [vmem:[%s3132_s1 + $0x98] sm:$0xff] (!%p292_p9)  ;;  %v2167_v8 = vmov (!%p292_p9), 0   ;;  %v2168_v12 = vmov (!%p292_p9), 2  }
  0x11   : > { %295 = sbr.rel (%p292_p9) target bundleno = 1094 (0x446), region = 56  ;;  %v2279_v2 = vld [vmem:[%s3132_s1] sm:$0xff] (!%p292_p9)  ;;  %2015 = vset.pattern.permute.xlu0 (!%p292_p9), %v2166_v3  ;;  %2013 = vset.pattern.permute.xlu1 (!%p292_p9), %v2166_v3  ;;  %v333_v6 = vld [vmem:[%s3132_s1 + $0x10] sm:$0xff] (!%p292_p9)  ;;  %v332_v7 = vld [vmem:[%s3132_s1 + $0x8] sm:$0xff] (!%p292_p9)  ;;  %p325_p10 = scmp.lt.s32.totalorder (!%p292_p9), %s2244_s8, 1 }
  0x12   : > { %624 = vperm.xlu1 (!%p292_p9), %2013, %v2274_v1   ;;  %560 = vperm.xlu0 (!%p292_p9), %2015, %v2279_v2   ;;  %v2301_v9 = vld [vmem:[%s3132_s1 + $0xa0] sm:$0xff] (!%p292_p9)  ;;  %v2306_v10 = vld [vmem:[%s3132_s1 + $0xb0] sm:$0xff] (!%p292_p9)  ;;  %v334_v17 = vld [vmem:[%s3132_s1 + $0x18] sm:$0xff] (!%p292_p9)  ;;  %s323_s25 = sand.u32 (!%p292_p9), 1, %s2156_s12  }
  0x13   : > { %v2314_v11 = vld [vmem:[%s3132_s1 + $0xc0] sm:$0xff] (!%p292_p9)  ;;  %v2322_v13 = vld [vmem:[%s3132_s1 + $0xd0] sm:$0xff] (!%p292_p9)  ;;  %v952_v19 = vld [vmem:[%s3133_s2 + $0x8] sm:$0xff] (!%p292_p9)  ;;  %s324_s27 = scalar_lea.vmem (!%p292_p9), [#allocation3], %s323_s25  ;;  %s1776_s15 = scalar_lea.sflag (!%p292_p9), [#allocation4], %s323_s25 }
  0x14   : > { %v2329_v14 = vld [vmem:[%s3132_s1 + $0xe0] sm:$0xff] (!%p292_p9)  ;;  %v2335_v15 = vld [vmem:[%s3132_s1 + $0xf0] sm:$0xff] (!%p292_p9)  ;;  %v352_v20 = vld [vmem:[%s3132_s1 + $0xa8] sm:$0xff] (!%p292_p9)  ;;  %s1788_s28 = sshll.u32 (!%p292_p9), %s324_s27, 4  ;;  %s3091_s28 = int_to_ptr.vmem [resolvable:$true] %s1788_s28 }
  0x15   : > { %v349_v16 = vld [vmem:[%s3132_s1 + $0x90] sm:$0xff] (!%p292_p9)  ;;  %v967_v18 = vld [vmem:[%s3133_s2 + $0x80] sm:$0xff] (!%p292_p9)  ;;  %v968_v21 = vld [vmem:[%s3133_s2 + $0x88] sm:$0xff] (!%p292_p9)  ;;  %s2102_s17 = scalar_lea.vmem (!%p292_p9), %s3091_s28, 16 }
  0x16   : > { %628 = vperm.xlu1 (!%p292_p9), %2013, %v348_v4   ;;  %636 = vperm.xlu0 (!%p292_p9), %2015, %v350_v5   ;;  %v335_v22 = vld [vmem:[%s3132_s1 + $0x20] sm:$0xff] (!%p292_p9)  ;;  %v336_v24 = vld [vmem:[%s3132_s1 + $0x28] sm:$0xff] (!%p292_p9)  ;;  %v970_v25 = vld [vmem:[%s3133_s2 + $0x98] sm:$0xff] (!%p292_p9)  ;;  %p2103_p11 = scmp.ne.s32.totalorder (!%p292_p9), %s3091_s28, %s2102_s17 }
  0x17   : > { %v951_v23 = vld [vmem:[%s3133_s2] sm:$0xff] (!%p292_p9)  ;;  %v953_v26 = vld [vmem:[%s3133_s2 + $0x10] sm:$0xff] (!%p292_p9)  ;;  %v2402_v28 = vld [vmem:[%s3132_s1 + $0x38] sm:$0xff] (!%p292_p9) }
  0x18   : > { %v969_v27 = vld [vmem:[%s3133_s2 + $0x90] sm:$0xff]  ;;  %v972_v29 = vld [vmem:[%s3133_s2 + $0xa8] sm:$0xff]  ;;  %v954_v30 = vld [vmem:[%s3133_s2 + $0x18] sm:$0xff]  ;;  %s326_s23 = scalar_select %p325_p10, %s2244_s8, 1 }
  0x19   : > { %v955_v31 = vld [vmem:[%s3133_s2 + $0x20] sm:$0xff]  ;;  %v354_v32 = vld [vmem:[%s3132_s1 + $0xb8] sm:$0xff]  ;;  %v2427_v35 = vld [vmem:[%s3132_s1 + $0x48] sm:$0xff]  ;;  %p2104_p12 = pnand %p2103_p11, %p2261_p5 }
  0x1a   : > { %2014 = vset.pattern.permute.xlu1 %v2167_v8  ;;  %568 = vperm.xlu0 %2015, %v333_v6   ;;  %v974_v38 = vld [vmem:[%s3133_s2 + $0xb8] sm:$0xff]  ;;  %v337_v39 = vld [vmem:[%s3132_s1 + $0x30] sm:$0xff]  ;;  %v976_v49 = vld [vmem:[%s3133_s2 + $0xc8] sm:$0xff]  ;;  %s1847_s26 = sshll.u32 %s326_s23, 2 }
  0x1b   : > { %370 = vperm.xlu1 %2014, %v332_v7   ;;  %v957_v41 = vld [vmem:[%s3133_s2 + $0x30] sm:$0xff]  ;;  %v2460_v46 = vld [vmem:[%s3132_s1 + $0x58] sm:$0xff]  ;;  %v959_v52 = vld [vmem:[%s3133_s2 + $0x40] sm:$0xff]  ;;  %s328_s10 = scalar_lea.vmem %s3131_s0, %s1847_s26  ;;  %s1868_s26 = sshll.u32 %s2244_s8, 4 }
  0x1c   : > { %v971_v53 = vld [vmem:[%s3133_s2 + $0xa0] sm:$0xff]  ;;  %v2496_v58 = vld [vmem:[%s3132_s1 + $0x68] sm:$0xff]  ;;  %v978_v59 = vld [vmem:[%s3133_s2 + $0xd8] sm:$0xff]  ;;  %p2105_p13 = pneg %p2104_p12  ;;  %s2169_s8 = smov [#allocation3]  }
  0x1d   : > { %v956_v62 = vld [vmem:[%s3133_s2 + $0x28] sm:$0xff]  ;;  %v961_v63 = vld [vmem:[%s3133_s2 + $0x50] sm:$0xff]  ;;  %s2106_s18 = sshll.u32 %s2169_s8, 4  ;;  %s2107_s18 = int_to_ptr.vmem [resolvable:$false] %s2106_s18 }
  0x1e   : > { %640 = vperm.xlu0 %2015, %v2301_v9   ;;  %s2108_s22 = scalar_lea.vmem %s2107_s18, 32  ;;  %p2109_p0 = scmp.lt.s32.totalorder %s3091_s28, %s2107_s18 }
  0x1f   : > { %2016 = vset.pattern.permute.xlu1 %v2166_v3  ;;  %p2110_p1 = scmp.lt.s32.totalorder %s2108_s22, %s2102_s17 }
  0x20   : > { %564 = vperm.xlu1 %2016, %v332_v7  }
  0x21   : > { %p2111_p2 = por %p2110_p1, %p2109_p0 }
  0x22   : > { %648 = vperm.xlu0 %2015, %v2306_v10  }
  0x23   : > { %p2112_p3 = pnand %p2111_p2, %p2105_p13 }
  0x24   : > { %2017 = vset.pattern.permute.xlu1 %v2168_v12 }
  0x25   : > { %820 = vperm.xlu1 %2017, %v2274_v1  }
  0x26   : > { %656 = vperm.xlu0 %2015, %v2314_v11  }
  0x29   : > { %756 = vperm.xlu1 %2017, %v2279_v2  }
  0x2a   : > { %664 = vperm.xlu0 %2015, %v2322_v13  }
  0x2d   : > { %760 = vperm.xlu1 %2017, %v332_v7  }
  0x2e   : > { %672 = vperm.xlu0 %2015, %v2329_v14  }
  0x31   : > { %2018 = vset.pattern.permute.xlu1 %v2167_v8 }
  0x32   : > { %460 = vperm.xlu1 %2018, %v350_v5   ;;  %680 = vperm.xlu0 %2015, %v2335_v15  }
  0x36   : > { %2019 = vset.pattern.permute.xlu1 %v2166_v3  ;;  %2061 = vset.pattern.permute.xlu0 %v2168_v12 }
  0x37   : > { %632 = vperm.xlu1 %2019, %v349_v16   ;;  %824 = vperm.xlu0 %2061, %v348_v4  }
  0x3b   : > { %2020 = vset.pattern.permute.xlu1 %v2167_v8  ;;  %828 = vperm.xlu0 %2061, %v349_v16  }
  0x3c   : > { %375 = vperm.xlu1 %2020, %v333_v6  }
  0x3f   : > { %836 = vperm.xlu0 %2061, %v2301_v9  }
  0x40   : > { %380 = vperm.xlu1 %2020, %v334_v17  }
  0x43   : > { %844 = vperm.xlu0 %2061, %v2306_v10  }
  0x44   : > { %2021 = vset.pattern.permute.xlu1 %v2166_v3 }
  0x45   : > { %572 = vperm.xlu1 %2021, %v334_v17  }
  0x47   : > { %852 = vperm.xlu0 %2061, %v2314_v11  }
  0x49   : > { %2022 = vset.pattern.permute.xlu1 %v2168_v12 }
  0x4a   : > { %832 = vperm.xlu1 %2022, %v350_v5  }
  0x4b   : > { %860 = vperm.xlu0 %2061, %v2322_v13  }
  0x4e   : > { %2023 = vset.pattern.permute.xlu1 %v2167_v8 }
  0x4f   : > { %1065 = vperm.xlu1 %2023, %v967_v18   ;;  %868 = vperm.xlu0 %2061, %v2329_v14   ;;  %v981_v18 = vld [vmem:[%s3133_s2 + $0xf0] sm:$0xff] }
  0x53   : > { %2024 = vset.pattern.permute.xlu1 %v2168_v12  ;;  %876 = vperm.xlu0 %2061, %v2335_v15  }
  0x54   : > { %764 = vperm.xlu1 %2024, %v333_v6   ;;  %v2529_v6 = vld [vmem:[%s3132_s1 + $0x78] sm:$0xff] }
  0x57   : > { %2065 = vset.pattern.permute.xlu0 %v2167_v8 }
  0x58   : > { %768 = vperm.xlu1 %2024, %v334_v17   ;;  %445 = vperm.xlu0 %2065, %v2274_v1   ;;  %v523_v17 = vlaneseq }
  0x5c   : > { %2025 = vset.pattern.permute.xlu1 %v2167_v8  ;;  %450 = vperm.xlu0 %2065, %v348_v4  }
  0x5d   : > { %990 = vperm.xlu1 %2025, %v952_v19  }
  0x60   : > { %365 = vperm.xlu0 %2065, %v2279_v2   ;;  %v356_v2 = vld [vmem:[%s3132_s1 + $0xc8] sm:$0xff] }
  0x61   : > { %470 = vperm.xlu1 %2025, %v352_v20  }
  0x64   : > { %455 = vperm.xlu0 %2065, %v349_v16  }
  0x65   : > { %2026 = vset.pattern.permute.xlu1 %v2166_v3 }
  0x66   : > { %644 = vperm.xlu1 %2026, %v352_v20  }
  0x68   : > { %1070 = vperm.xlu0 %2065, %v968_v21   ;;  %v2561_v21 = vshrl.u32 %v523_v17, 7 }
  0x6a   : > { %2027 = vset.pattern.permute.xlu1 %v2167_v8 }
  0x6b   : > { %385 = vperm.xlu1 %2027, %v335_v22  }
  0x6c   : > { %985 = vperm.xlu0 %2065, %v951_v23  }
  0x6f   : > { %2028 = vset.pattern.permute.xlu1 %v2166_v3 }
  0x70   : > { %576 = vperm.xlu1 %2028, %v335_v22   ;;  %465 = vperm.xlu0 %2065, %v2301_v9  }
  0x74   : > { %580 = vperm.xlu1 %2028, %v336_v24   ;;  %390 = vperm.xlu0 %2065, %v336_v24  }
  0x78   : > { %2029 = vset.pattern.permute.xlu1 %v2168_v12  ;;  %1080 = vperm.xlu0 %2065, %v970_v25   ;;  %v689_v25 = vsub.s32 1, %v2561_v21 }
  0x79   : > { %840 = vperm.xlu1 %2029, %v352_v20  }
  0x7c   : > { %995 = vperm.xlu0 %2065, %v953_v26   ;;  %v525_v26 = vsub.s32 0, %v2561_v21 }
  0x7d   : > { %2030 = vset.pattern.permute.xlu1 %v2167_v8 }
  0x7e   : > { %1075 = vperm.xlu1 %2030, %v969_v27   ;;  %v330_v27 = vld [vmem:[%s328_s10] sm:$0x7]  ;;  %s3089_s10 = scalar_lea.hbm %s3140_s9, %s1868_s26 }
  0x80   : > { %475 = vperm.xlu0 %2065, %v2306_v10   ;;  %v980_v10 = vld [vmem:[%s3133_s2 + $0xe8] sm:$0xff] }
  0x82   : > { %2031 = vset.pattern.permute.xlu1 %v2168_v12 }
  0x83   : > { %772 = vperm.xlu1 %2031, %v335_v22   ;;  %v965_v22 = vld [vmem:[%s3133_s2 + $0x70] sm:$0xff] }
  0x84   : > { %400 = vperm.xlu0 %2065, %v2402_v28  }
  0x87   : > { %776 = vperm.xlu1 %2031, %v336_v24  }
  0x88   : > { %1090 = vperm.xlu0 %2065, %v972_v29  }
  0x8b   : > { %2032 = vset.pattern.permute.xlu1 %v2167_v8 }
  0x8c   : > { %1000 = vperm.xlu1 %2032, %v954_v30   ;;  %1005 = vperm.xlu0 %2065, %v955_v31   ;;  %v2582_v31 = vrot.slane %v330_v27, %v689_v25 }
  0x90   : > { %480 = vperm.xlu1 %2032, %v354_v32   ;;  %485 = vperm.xlu0 %2065, %v2314_v11  }
  0x91   : > { %v2420_v33 = vpop.permute.xlu1 %624  ;;  %v2422_v34 = vpop.permute.xlu0 %560 }
  0x94   : > { %2033 = vset.pattern.permute.xlu1 %v2166_v3  ;;  %410 = vperm.xlu0 %2065, %v2427_v35  }
  0x95   : > { %v2431_v36 = vpop.permute.xlu1 %628  ;;  %652 = vperm.xlu1 %2033, %v354_v32   ;;  %v2433_v37 = vpop.permute.xlu0 %636 }
  0x96   : > { %v708_v17 = vmul.f32 %v2582_v31, %v2431_v36 }
  0x98   : > { %1100 = vperm.xlu0 %2065, %v974_v38   ;;  %v885_v38 = vsub.s32 2, %v2561_v21 }
  0x99   : > { %2034 = vset.pattern.permute.xlu1 %v2167_v8  ;;  %v2442_v40 = vpop.permute.xlu0 %568 }
  0x9a   : > { %v2447_v42 = vpop.permute.xlu1 %370  ;;  %395 = vperm.xlu1 %2034, %v337_v39  }
  0x9c   : > { %1015 = vperm.xlu0 %2065, %v957_v41   ;;  %v1241_v41 = vld [vmem:[%s3135_s4 + $0x10] sm:$0xff] }
  0x9d   : > { %v2449_v43 = vpop.permute.xlu0 %640 }
  0x9e   : > { %2035 = vset.pattern.permute.xlu1 %v2166_v3 }
  0x9f   : > { %v2452_v44 = vpop.permute.xlu1 %564  ;;  %584 = vperm.xlu1 %2035, %v337_v39  }
  0xa0   : > { %495 = vperm.xlu0 %2065, %v2322_v13   ;;  %v339_v13 = vld [vmem:[%s3132_s1 + $0x40] sm:$0xff]  ;;  %v692_v25 = vmul.f32 %v2582_v31, %v2452_v44 }
  0xa1   : > { %v2455_v45 = vpop.permute.xlu0 %648 }
  0xa3   : > { %588 = vperm.xlu1 %2035, %v2402_v28  }
  0xa4   : > { %v2463_v47 = vpop.permute.xlu1 %820  ;;  %420 = vperm.xlu0 %2065, %v2460_v46  }
  0xa5   : > { %v2466_v48 = vpop.permute.xlu0 %656 }
  0xa7   : > { %2036 = vset.pattern.permute.xlu1 %v2168_v12 }
  0xa8   : > { %848 = vperm.xlu1 %2036, %v354_v32   ;;  %v2472_v50 = vpop.permute.xlu1 %756  ;;  %1110 = vperm.xlu0 %2065, %v976_v49   ;;  %v2586_v32 = vrot.slane %v330_v27, %v525_v26 }
  0xa9   : > { %v2474_v51 = vpop.permute.xlu0 %664 }
  0xac   : > { %2037 = vset.pattern.permute.xlu1 %v2167_v8  ;;  %v2483_v54 = vpop.permute.xlu1 %760  ;;  %1025 = vperm.xlu0 %2065, %v959_v52  }
  0xad   : > { %1085 = vperm.xlu1 %2037, %v971_v53   ;;  %v2485_v55 = vpop.permute.xlu0 %672  ;;  %v707_v53 = vmul.f32 %v2582_v31, %v2420_v33 }
  0xb0   : > { %505 = vperm.xlu0 %2065, %v2329_v14  }
  0xb1   : > { %2038 = vset.pattern.permute.xlu1 %v2168_v12  ;;  %v2489_v56 = vpop.permute.xlu1 %460  ;;  %v2491_v57 = vpop.permute.xlu0 %680 }
  0xb2   : > { %780 = vperm.xlu1 %2038, %v337_v39   ;;  %v973_v39 = vld [vmem:[%s3133_s2 + $0xb0] sm:$0xff] }
  0xb4   : > { %430 = vperm.xlu0 %2065, %v2496_v58  }
  0xb6   : > { %784 = vperm.xlu1 %2038, %v2402_v28   ;;  %v2503_v60 = vpop.permute.xlu1 %632  ;;  %v2505_v61 = vpop.permute.xlu0 %824  ;;  %v1239_v28 = vld [vmem:[%s3135_s4] sm:$0xff] }
  0xb8   : > { %1120 = vperm.xlu0 %2065, %v978_v59   ;;  %v2599_v59 = vrot.slane %v330_v27, %v885_v38  ;;  %v1245_v27 = vld [vmem:[%s3135_s4 + $0x30] sm:$0xff] }
  0xba   : > { %2039 = vset.pattern.permute.xlu1 %v2167_v8  ;;  %v2514_v0 = vpop.permute.xlu0 %828  ;;  %v904_v36 = vmul.f32 %v2599_v59, %v2505_v61  ;;  %v1247_v61 = vld [vmem:[%s3135_s4 + $0x40] sm:$0xff] }
  0xbb   : > { %1010 = vperm.xlu1 %2039, %v956_v62   ;;  %v2516_v1 = vpop.permute.xlu1 %375 }
  0xbc   : > { %1035 = vperm.xlu0 %2065, %v961_v63   ;;  %v1243_v63 = vld [vmem:[%s3135_s4 + $0x20] sm:$0xff] }
  0xbe   : > { %v2521_v4 = vpop.permute.xlu0 %836 }
  0xbf   : > { %490 = vperm.xlu1 %2039, %v356_v2   ;;  %v2523_v5 = vpop.permute.xlu1 %380 }
  0xc0   : > { %515 = vperm.xlu0 %2065, %v2335_v15   ;;  %v963_v15 = vld [vmem:[%s3133_s2 + $0x60] sm:$0xff] }
  0xc2   : > { %v2531_v7 = vpop.permute.xlu0 %844 }
  0xc3   : > { %2040 = vset.pattern.permute.xlu1 %v2166_v3 }
  0xc4   : > { %660 = vperm.xlu1 %2040, %v356_v2   ;;  %v2534_v9 = vpop.permute.xlu1 %572  ;;  %440 = vperm.xlu0 %2065, %v2529_v6  }
  0xc6   : > { %v2540_v11 = vpop.permute.xlu0 %852 }
  0xc8   : > { %2041 = vset.pattern.permute.xlu1 %v2167_v8  ;;  %1130 = vperm.xlu0 %2065, %v980_v10  }
  0xc9   : > { %405 = vperm.xlu1 %2041, %v339_v13   ;;  %v2547_v14 = vpop.permute.xlu1 %832 }
  0xca   : > { %v2552_v16 = vpop.permute.xlu0 %860 }
  0xcc   : > { %1045 = vperm.xlu0 %2065, %v963_v15  }
  0xcd   : > { %2042 = vset.pattern.permute.xlu1 %v2166_v3 }
  0xce   : > { %592 = vperm.xlu1 %2042, %v339_v13   ;;  %v1066_v19 = vpop.permute.xlu1 %1065  ;;  %v2559_v20 = vpop.permute.xlu0 %868 }
  0xd0   : > { %1135 = vperm.xlu0 %2065, %v981_v18   ;;  %v903_v18 = vmul.f32 %v2599_v59, %v2463_v47 }
  0xd2   : > { %596 = vperm.xlu1 %2042, %v2427_v35   ;;  %v2570_v23 = vpop.permute.xlu0 %876 }
  0xd3   : > { %v2572_v24 = vpop.permute.xlu1 %764 }
  0xd4   : > { %1055 = vperm.xlu0 %2065, %v965_v22   ;;  %v691_v22 = vmul.f32 %v2582_v31, %v2422_v34  ;;  %v888_v34 = vmul.f32 %v2599_v59, %v2483_v54  ;;  %v887_v54 = vmul.f32 %v2599_v59, %v2472_v50  ;;  %v2646_v50 = vld [vmem:[%s3132_s1 + $0xd8] sm:$0xff] }
  0xd6   : > { %2043 = vset.pattern.permute.xlu1 %v2168_v12 }
  0xd7   : > { %856 = vperm.xlu1 %2043, %v356_v2   ;;  %v2580_v29 = vpop.permute.xlu1 %768  ;;  %v446_v30 = vpop.permute.xlu0 %445 }
  0xd8   : > { %1257 = vperm.xlu0 %2065, %v1239_v28   ;;  %v543_v49 = vmul.f32 %v2586_v32, %v446_v30 }
  0xda   : > { %v739_v2 = vadd.f32 %v707_v53, %v543_v49 }
  0xdb   : > { %2044 = vset.pattern.permute.xlu1 %v2167_v8  ;;  %v451_v52 = vpop.permute.xlu0 %450 }
  0xdc   : > { %1095 = vperm.xlu1 %2044, %v973_v39   ;;  %v991_v62 = vpop.permute.xlu1 %990  ;;  %1267 = vperm.xlu0 %2065, %v1241_v41   ;;  %v544_v10 = vmul.f32 %v2586_v32, %v451_v52  ;;  %v935_v30 = vadd.f32 %v903_v18, %v739_v2  ;;  %v528_v39 = vmul.f32 %v2586_v32, %v2447_v42  ;;  %v958_v42 = vld [vmem:[%s3133_s2 + $0x38] sm:$0xff]  ;;  %v1249_v2 = vld [vmem:[%s3135_s4 + $0x50] sm:$0xff] }
  0xde   : > { %v740_v47 = vadd.f32 %v708_v17, %v544_v10  ;;  %v1159_v52 = vadd.f32 %v1066_v19, %v935_v30 }
  0xdf   : > { %v366_v15 = vpop.permute.xlu0 %365 }
  0xe0   : > { %2045 = vset.pattern.permute.xlu1 %v2168_v12  ;;  %v2610_v33 = vpop.permute.xlu1 %470  ;;  %1277 = vperm.xlu0 %2065, %v1243_v63   ;;  %v527_v28 = vmul.f32 %v2586_v32, %v366_v15  ;;  %v936_v49 = vadd.f32 %v904_v36, %v740_v47  ;;  %v1191_v18 = vmax.f32 %v1159_v52, 0.0  ;;  %v1251_v36 = vld [vmem:[%s3135_s4 + $0x60] sm:$0xff] }
  0xe1   : > { %788 = vperm.xlu1 %2045, %v339_v13   ;;  %v724_v13 = vadd.f32 %v692_v25, %v528_v39 }
  0xe2   : > { %v723_v41 = vadd.f32 %v691_v22, %v527_v28 }
  0xe3   : > { %v456_v38 = vpop.permute.xlu0 %455  ;;  %v920_v63 = vadd.f32 %v888_v34, %v724_v13  ;;  %v1253_v34 = vld [vmem:[%s3135_s4 + $0x70] sm:$0xff] }
  0xe4   : > { %1287 = vperm.xlu0 %2065, %v1245_v27   ;;  %v919_v17 = vadd.f32 %v887_v54, %v723_v41  ;;  %v710_v41 = vmul.f32 %v2582_v31, %v2433_v37  ;;  %v545_v52 = vmul.f32 %v2586_v32, %v456_v38  ;;  %v709_v54 = vmul.f32 %v2582_v31, %v2503_v60 }
  0xe5   : > { %792 = vperm.xlu1 %2045, %v2427_v35   ;;  %v2627_v44 = vpop.permute.xlu1 %644  ;;  %v1144_v10 = vadd.f32 %v991_v62, %v920_v63  ;;  %v906_v37 = vmul.f32 %v2599_v59, %v2547_v14  ;;  %v905_v38 = vmul.f32 %v2599_v59, %v2514_v0  ;;  %v1689_v0 = vld [vmem:[%s3138_s7] sm:$0xff] }
  0xe6   : > { %v741_v63 = vadd.f32 %v709_v54, %v545_v52  ;;  %v890_v52 = vmul.f32 %v2599_v59, %v2580_v29 }
  0xe7   : > { %v1071_v53 = vpop.permute.xlu0 %1070  ;;  %v1176_v62 = vmax.f32 %v1144_v10, 0.0  ;;  %v1546_v10 = vld [vmem:[%s3137_s6 + $0x10] sm:$0xff] }
  0xe8   : > { %v1160_v35 = vadd.f32 %v1071_v53, %v936_v49  ;;  %1297 = vperm.xlu0 %2065, %v1247_v61   ;;  %v546_v49 = vmul.f32 %v2586_v32, %v2489_v56  ;;  %v341_v53 = vld [vmem:[%s3132_s1 + $0x50] sm:$0xff]  ;;  %v937_v14 = vadd.f32 %v905_v38, %v741_v63  ;;  %v1551_v63 = vld [vmem:[%s3137_s6 + $0x38] sm:$0xff] }
  0xe9   : > { %2046 = vset.pattern.permute.xlu1 %v2167_v8 }
  0xea   : > { %v1192_v15 = vmax.f32 %v1160_v35, 0.0  ;;  %1020 = vperm.xlu1 %2046, %v958_v42   ;;  %v2641_v19 = vpop.permute.xlu1 %385  ;;  %v1544_v42 = vld [vmem:[%s3137_s6] sm:$0xff]  ;;  %v742_v56 = vadd.f32 %v710_v41, %v546_v49  ;;  %v889_v41 = vmul.f32 %v2599_v59, %v2572_v24 }
  0xeb   : > { %v986_v22 = vpop.permute.xlu0 %985 }
  0xec   : > { %v1143_v25 = vadd.f32 %v986_v22, %v919_v17  ;;  %1307 = vperm.xlu0 %2065, %v1249_v2   ;;  %v1231_v27 = vpack.c.bf16 %v1192_v15, %v1191_v18  ;;  %v938_v60 = vadd.f32 %v906_v37, %v742_v56  ;;  %v975_v37 = vld [vmem:[%s3133_s2 + $0xc0] sm:$0xff]  ;;  %v1550_v56 = vld [vmem:[%s3137_s6 + $0x30] sm:$0xff] }
  0xee   : > { %v1175_v47 = vmax.f32 %v1143_v25, 0.0  ;;  %500 = vperm.xlu1 %2046, %v2646_v50   ;;  %1871 = vmatprep.subr.bf16.mxu0 %v1231_v27  ;;  %v1548_v27 = vld [vmem:[%s3137_s6 + $0x20] sm:$0xff] }
  0xef   : > { %v2652_v28 = vpop.permute.xlu1 %576  ;;  %v2654_v30 = vpop.permute.xlu0 %465 }
  0xf0   : > { %1317 = vperm.xlu0 %2065, %v1251_v36   ;;  %v1223_v39 = vpack.c.bf16 %v1176_v62, %v1175_v47  ;;  %v693_v36 = vmul.f32 %v2582_v31, %v2442_v40  ;;  %v529_v62 = vmul.f32 %v2586_v32, %v2516_v1  ;;  %v1549_v40 = vld [vmem:[%s3137_s6 + $0x28] sm:$0xff]  ;;  %v530_v1 = vmul.f32 %v2586_v32, %v2523_v5 }
  0xf2   : > { %2047 = vset.pattern.permute.xlu1 %v2166_v3  ;;  %1872 = vmatpush3.bf16.msra.mxu0 %v1223_v39  ;;  %v725_v49 = vadd.f32 %v693_v36, %v529_v62  ;;  %v547_v36 = vmul.f32 %v2586_v32, %v2654_v30  ;;  %v548_v30 = vmul.f32 %v2586_v32, %v2610_v33 }
  0xf3   : > { %668 = vperm.xlu1 %2047, %v2646_v50   ;;  %v2661_v61 = vpop.permute.xlu1 %580  ;;  %v2663_v13 = vpop.permute.xlu0 %390 }
  0xf4   : > { %1327 = vperm.xlu0 %2065, %v1253_v34   ;;  %v694_v34 = vmul.f32 %v2582_v31, %v2534_v9  ;;  %v921_v54 = vadd.f32 %v889_v41, %v725_v49  ;;  %v343_v41 = vld [vmem:[%s3132_s1 + $0x60] sm:$0xff] }
  0xf7   : > { %2048 = vset.pattern.permute.xlu1 %v2167_v8  ;;  %v1081_v2 = vpop.permute.xlu0 %1080 }
  0xf8   : > { %415 = vperm.xlu1 %2048, %v341_v53   ;;  %v2683_v35 = vpop.permute.xlu1 %840  ;;  %1554 = vperm.xlu0 %2065, %v1544_v42   ;;  %v1162_v15 = vadd.f32 %v1081_v2, %v938_v60  ;;  %v726_v42 = vadd.f32 %v694_v34, %v530_v1  ;;  %v712_v34 = vmul.f32 %v2582_v31, %v2627_v44 }
  0xf9   : > { %v908_v49 = vmul.f32 %v2599_v59, %v2683_v35  ;;  %v695_v35 = vmul.f32 %v2582_v31, %v2652_v28 }
  0xfa   : > { %v1194_v22 = vmax.f32 %v1162_v15, 0.0  ;;  %v922_v29 = vadd.f32 %v890_v52, %v726_v42  ;;  %v744_v1 = vadd.f32 %v712_v34, %v548_v30  ;;  %v962_v30 = vld [vmem:[%s3133_s2 + $0x58] sm:$0xff] }
  0xfb   : > { %v996_v24 = vpop.permute.xlu0 %995 }
  0xfc   : > { %2049 = vset.pattern.permute.xlu1 %v2166_v3  ;;  %1564 = vperm.xlu0 %2065, %v1546_v10   ;;  %v1145_v5 = vadd.f32 %v996_v24, %v921_v54  ;;  %v940_v24 = vadd.f32 %v908_v49, %v744_v1  ;;  %v362_v49 = vld [vmem:[%s3132_s1 + $0xf8] sm:$0xff] }
  0xfd   : > { %600 = vperm.xlu1 %2049, %v341_v53   ;;  %v1076_v17 = vpop.permute.xlu1 %1075 }
  0xfe   : > { %v1161_v18 = vadd.f32 %v1076_v17, %v937_v14  ;;  %v1177_v2 = vmax.f32 %v1145_v5, 0.0  ;;  %v1695_v14 = vld [vmem:[%s3138_s7 + $0x30] sm:$0xff] }
 0x100   : > { %v1193_v25 = vmax.f32 %v1161_v18, 0.0  ;;  %1699 = vperm.xlu0 %2065, %v1689_v0   ;;  %v1758_v0 = vld [vmem:[#allocation2] sm:$0x1]  ;;  %v960_v18 = vld [vmem:[%s3133_s2 + $0x48] sm:$0xff] }
 0x101   : > { %604 = vperm.xlu1 %2049, %v2460_v46  }
 0x102   : > { %v2700_v47 = vpop.permute.xlu1 %772  ;;  %v1232_v39 = vpack.c.bf16 %v1194_v22, %v1193_v25  ;;  %v360_v22 = vld [vmem:[%s3132_s1 + $0xe8] sm:$0xff]  ;;  %v2745_v25 = vpop.permute.xlu0 %475 }
 0x104   : > { %1574 = vperm.xlu0 %2065, %v1548_v27   ;;  %1873 = vmatprep.subr.bf16.mxu0 %v1232_v39  ;;  %v711_v27 = vmul.f32 %v2582_v31, %v2449_v43  ;;  %v907_v43 = vmul.f32 %v2599_v59, %v2521_v4 }
 0x105   : > { %2050 = vset.pattern.permute.xlu1 %v2168_v12 }
 0x106   : > { %864 = vperm.xlu1 %2050, %v2646_v50   ;;  %v2715_v9 = vpop.permute.xlu1 %776  ;;  %v2754_v62 = vpop.permute.xlu0 %400 }
 0x107   : > { %v892_v28 = vmul.f32 %v2599_v59, %v2715_v9 }
 0x108   : > { %1579 = vperm.xlu0 %2065, %v1549_v40   ;;  %v743_v40 = vadd.f32 %v711_v27, %v547_v36 }
 0x10a   : > { %2051 = vset.pattern.permute.xlu1 %v2167_v8  ;;  %v1091_v44 = vpop.permute.xlu0 %1090  ;;  %v939_v42 = vadd.f32 %v907_v43, %v743_v40 }
 0x10b   : > { %1105 = vperm.xlu1 %2051, %v975_v37   ;;  %v1001_v50 = vpop.permute.xlu1 %1000  ;;  %v1164_v54 = vadd.f32 %v1091_v44, %v940_v24  ;;  %v713_v24 = vmul.f32 %v2582_v31, %v2455_v45  ;;  %v909_v45 = vmul.f32 %v2599_v59, %v2531_v7 }
 0x10c   : > { %v1146_v38 = vadd.f32 %v1001_v50, %v922_v29  ;;  %1584 = vperm.xlu0 %2065, %v1550_v56   ;;  %v531_v50 = vmul.f32 %v2586_v32, %v2641_v19 }
 0x10d   : > { %v1196_v56 = vmax.f32 %v1164_v54, 0.0 }
 0x10e   : > { %v1178_v10 = vmax.f32 %v1146_v38, 0.0  ;;  %v696_v38 = vmul.f32 %v2582_v31, %v2661_v61  ;;  %v1006_v19 = vpop.permute.xlu0 %1005  ;;  %v977_v61 = vld [vmem:[%s3133_s2 + $0xd0] sm:$0xff] }
 0x10f   : > { %2052 = vset.pattern.permute.xlu1 %v2168_v12  ;;  %v2728_v60 = vpop.permute.xlu1 %480 }
 0x110   : > { %796 = vperm.xlu1 %2052, %v341_v53   ;;  %1589 = vperm.xlu0 %2065, %v1551_v63   ;;  %v1224_v15 = vpack.c.bf16 %v1178_v10, %v1177_v2  ;;  %v532_v63 = vmul.f32 %v2586_v32, %v2663_v13  ;;  %v891_v2 = vmul.f32 %v2599_v59, %v2700_v47 }
 0x111   : > { %v727_v10 = vadd.f32 %v695_v35, %v531_v50  ;;  %v550_v54 = vmul.f32 %v2586_v32, %v2728_v60 }
 0x112   : > { %1874 = vmatpush3.bf16.msra.mxu0 %v1224_v15 }
 0x114   : > { %800 = vperm.xlu1 %2052, %v2460_v46   ;;  %v2734_v17 = vpop.permute.xlu1 %652  ;;  %1729 = vperm.xlu0 %2065, %v1695_v14   ;;  %v728_v14 = vadd.f32 %v696_v38, %v532_v63 }
 0x116   : > { %v924_v47 = vadd.f32 %v892_v28, %v728_v14  ;;  %v534_v14 = vmul.f32 %v2586_v32, %v2754_v62 }
 0x118   : > { %2053 = vset.pattern.permute.xlu1 %v2167_v8  ;;  %1761 = vperm.xlu0 %2065, %v1758_v0   ;;  %v923_v0 = vadd.f32 %v891_v2, %v727_v10 }
 0x119   : > { %1030 = vperm.xlu1 %2053, %v960_v18   ;;  %v2740_v53 = vpop.permute.xlu1 %395 }
 0x11a   : > { %v1147_v13 = vadd.f32 %v1006_v19, %v923_v0  ;;  %v533_v7 = vmul.f32 %v2586_v32, %v2740_v53 }
 0x11c   : > { %v1179_v36 = vmax.f32 %v1147_v13, 0.0 }
 0x11d   : > { %510 = vperm.xlu1 %2053, %v360_v22  }
 0x11e   : > { %v2747_v46 = vpop.permute.xlu1 %584 }
 0x11f   : > { %v697_v63 = vmul.f32 %v2582_v31, %v2747_v46 }
 0x121   : > { %2054 = vset.pattern.permute.xlu1 %v2166_v3  ;;  %v729_v0 = vadd.f32 %v697_v63, %v533_v7  ;;  %v911_v63 = vmul.f32 %v2599_v59, %v2540_v11  ;;  %v1246_v11 = vld [vmem:[%s3135_s4 + $0x38] sm:$0xff] }
 0x122   : > { %676 = vperm.xlu1 %2054, %v360_v22   ;;  %v2756_v39 = vpop.permute.xlu1 %588 }
 0x123   : > { %v698_v46 = vmul.f32 %v2582_v31, %v2756_v39 }
 0x126   : > { %2055 = vset.pattern.permute.xlu1 %v2167_v8 }
 0x127   : > { %425 = vperm.xlu1 %2055, %v343_v41   ;;  %v849_v52 = vpop.permute.xlu1 %848 }
 0x12b   : > { %2056 = vset.pattern.permute.xlu1 %v2166_v3 }
 0x12c   : > { %608 = vperm.xlu1 %2056, %v343_v41   ;;  %v1086_v4 = vpop.permute.xlu1 %1085 }
 0x12d   : > { %v1163_v37 = vadd.f32 %v1086_v4, %v939_v42  ;;  %v549_v42 = vmul.f32 %v2586_v32, %v2745_v25  ;;  %v910_v4 = vmul.f32 %v2599_v59, %v849_v52 }
 0x12f   : > { %v1195_v33 = vmax.f32 %v1163_v37, 0.0 }
 0x130   : > { %612 = vperm.xlu1 %2056, %v2496_v58  }
 0x131   : > { %v2774_v5 = vpop.permute.xlu1 %780  ;;  %v1233_v29 = vpack.c.bf16 %v1196_v56, %v1195_v33  ;;  %v745_v33 = vadd.f32 %v713_v24, %v549_v42 }
 0x132   : > { %v893_v28 = vmul.f32 %v2599_v59, %v2774_v5  ;;  %v730_v5 = vadd.f32 %v698_v46, %v534_v14 }
 0x133   : > { %1875 = vmatprep.subr.bf16.mxu0 %v1233_v29  ;;  %v941_v52 = vadd.f32 %v909_v45, %v745_v33  ;;  %v1240_v33 = vld [vmem:[%s3135_s4 + $0x8] sm:$0xff] }
 0x134   : > { %2057 = vset.pattern.permute.xlu1 %v2168_v12 }
 0x135   : > { %872 = vperm.xlu1 %2057, %v360_v22   ;;  %v2787_v15 = vpop.permute.xlu1 %784 }
 0x136   : > { %v894_v53 = vmul.f32 %v2599_v59, %v2787_v15 }
 0x139   : > { %2058 = vset.pattern.permute.xlu1 %v2167_v8 }
 0x13a   : > { %1115 = vperm.xlu1 %2058, %v977_v61   ;;  %v1011_v18 = vpop.permute.xlu1 %1010  ;;  %v925_v61 = vadd.f32 %v893_v28, %v729_v0 }
 0x13b   : > { %v1148_v27 = vadd.f32 %v1011_v18, %v924_v47  ;;  %v979_v47 = vld [vmem:[%s3133_s2 + $0xe0] sm:$0xff]  ;;  %v926_v18 = vadd.f32 %v894_v53, %v730_v5 }
 0x13d   : > { %v1180_v34 = vmax.f32 %v1148_v27, 0.0 }
 0x13e   : > { %2059 = vset.pattern.permute.xlu1 %v2168_v12  ;;  %v2794_v9 = vpop.permute.xlu1 %490 }
 0x13f   : > { %804 = vperm.xlu1 %2059, %v343_v41   ;;  %v1225_v22 = vpack.c.bf16 %v1180_v34, %v1179_v36  ;;  %v2808_v41 = vpop.permute.xlu0 %485 }
 0x141   : > { %1876 = vmatpush3.bf16.msra.mxu0 %v1225_v22 }
 0x143   : > { %808 = vperm.xlu1 %2059, %v2496_v58   ;;  %v2797_v43 = vpop.permute.xlu1 %660  ;;  %v714_v58 = vmul.f32 %v2582_v31, %v2734_v17  ;;  %v2824_v37 = vpop.permute.xlu0 %410  ;;  %v345_v17 = vld [vmem:[%s3132_s1 + $0x70] sm:$0xff] }
 0x145   : > { %v746_v56 = vadd.f32 %v714_v58, %v550_v54  ;;  %v964_v58 = vld [vmem:[%s3133_s2 + $0x68] sm:$0xff] }
 0x147   : > { %2060 = vset.pattern.permute.xlu1 %v2167_v8  ;;  %v942_v35 = vadd.f32 %v910_v4, %v746_v56  ;;  %v1101_v29 = vpop.permute.xlu0 %1100 }
 0x148   : > { %1040 = vperm.xlu1 %2060, %v962_v30   ;;  %v2803_v40 = vpop.permute.xlu1 %405 }
 0x149   : > { %v1166_v60 = vadd.f32 %v1101_v29, %v942_v35  ;;  %v715_v35 = vmul.f32 %v2582_v31, %v2466_v48  ;;  %v551_v29 = vmul.f32 %v2586_v32, %v2808_v41  ;;  %v535_v53 = vmul.f32 %v2586_v32, %v2803_v40 }
 0x14b   : > { %v1198_v10 = vmax.f32 %v1166_v60, 0.0  ;;  %v1016_v62 = vpop.permute.xlu0 %1015  ;;  %v552_v60 = vmul.f32 %v2586_v32, %v2794_v9  ;;  %v747_v48 = vadd.f32 %v715_v35, %v551_v29  ;;  %v2072_v9 = vld [vmem:[%s3134_s3 + $0x4] ss:$8 sps:$4 sm:$0xff]   ;;  %v1547_v35 = vld [vmem:[%s3137_s6 + $0x18] sm:$0xff] }
 0x14c   : > { %520 = vperm.xlu1 %2060, %v362_v49   ;;  %v1149_v39 = vadd.f32 %v1016_v62, %v925_v61  ;;  %1447 = vmatprep.mubr.bf16.mxu0 %v2072_v9 }
 0x14d   : > { %v2810_v1 = vpop.permute.xlu1 %592  ;;  %v943_v7 = vadd.f32 %v911_v63, %v747_v48  ;;  %v1691_v48 = vld [vmem:[%s3138_s7 + $0x10] sm:$0xff] }
 0x14e   : > { %v1181_v34 = vmax.f32 %v1149_v39, 0.0  ;;  %v699_v0 = vmul.f32 %v2582_v31, %v2810_v1  ;;  %v536_v39 = vmul.f32 %v2586_v32, %v2824_v37 }
 0x14f   : > { %v2868_v42 = vpop.permute.xlu0 %495 }
 0x150   : > { %2062 = vset.pattern.permute.xlu1 %v2166_v3  ;;  %v731_v1 = vadd.f32 %v699_v0, %v535_v53 }
 0x151   : > { %684 = vperm.xlu1 %2062, %v362_v49   ;;  %v2815_v44 = vpop.permute.xlu1 %596 }
 0x155   : > { %2063 = vset.pattern.permute.xlu1 %v2167_v8 }
 0x156   : > { %435 = vperm.xlu1 %2063, %v345_v17   ;;  %v857_v25 = vpop.permute.xlu1 %856 }
 0x15a   : > { %2064 = vset.pattern.permute.xlu1 %v2166_v3 }
 0x15b   : > { %616 = vperm.xlu1 %2064, %v345_v17   ;;  %v1096_v50 = vpop.permute.xlu1 %1095 }
 0x15c   : > { %v1165_v38 = vadd.f32 %v1096_v50, %v941_v52  ;;  %v2891_v52 = vpop.permute.xlu0 %420 }
 0x15e   : > { %v1197_v2 = vmax.f32 %v1165_v38, 0.0  ;;  %v1242_v38 = vld [vmem:[%s3135_s4 + $0x18] sm:$0xff] }
 0x15f   : > { %620 = vperm.xlu1 %2064, %v2529_v6  }
 0x160   : > { %v2840_v19 = vpop.permute.xlu1 %788  ;;  %v1234_v3 = vpack.c.bf16 %v1198_v10, %v1197_v2  ;;  %v1111_v41 = vpop.permute.xlu0 %1110 }
 0x161   : > { %v895_v5 = vmul.f32 %v2599_v59, %v2840_v19 }
 0x162   : > { %1877 = vmatprep.subr.bf16.mxu0 %v1234_v3 }
 0x163   : > { %2066 = vset.pattern.permute.xlu1 %v2168_v12  ;;  %v927_v40 = vadd.f32 %v895_v5, %v731_v1  ;;  %v1694_v5 = vld [vmem:[%s3138_s7 + $0x28] sm:$0xff]  ;;  %v1696_v1 = vld [vmem:[%s3138_s7 + $0x38] sm:$0xff] }
 0x164   : > { %880 = vperm.xlu1 %2066, %v362_v49   ;;  %v2849_v13 = vpop.permute.xlu1 %792 }
 0x165   : > { %v896_v19 = vmul.f32 %v2599_v59, %v2849_v13 }
 0x168   : > { %2067 = vset.pattern.permute.xlu1 %v2167_v8 }
 0x169   : > { %1125 = vperm.xlu1 %2067, %v979_v47   ;;  %v1021_v27 = vpop.permute.xlu1 %1020 }
 0x16a   : > { %v1150_v36 = vadd.f32 %v1021_v27, %v926_v18  ;;  %v1248_v18 = vld [vmem:[%s3135_s4 + $0x48] sm:$0xff]  ;;  %v700_v27 = vmul.f32 %v2582_v31, %v2815_v44 }
 0x16b   : > { %v1252_v44 = vld [vmem:[%s3135_s4 + $0x68] sm:$0xff] }
 0x16c   : > { %v1182_v22 = vmax.f32 %v1150_v36, 0.0 }
 0x16d   : > { %2068 = vset.pattern.permute.xlu1 %v2168_v12  ;;  %v2856_v15 = vpop.permute.xlu1 %500  ;;  %v982_v12 = vld [vmem:[%s3133_s2 + $0xf8] sm:$0xff] }
 0x16e   : > { %v1226_v30 = vpack.c.bf16 %v1182_v22, %v1181_v34  ;;  %812 = vperm.xlu1 %2068, %v345_v17   ;;  %v1250_v34 = vld [vmem:[%s3135_s4 + $0x58] sm:$0xff]  ;;  %v732_v22 = vadd.f32 %v700_v27, %v536_v39 }
 0x170   : > { %1878 = vmatpush3.bf16.msra.mxu0 %v1226_v30  ;;  %v1026_v30 = vpop.permute.xlu0 %1025  ;;  %v928_v37 = vadd.f32 %v896_v19, %v732_v22 }
 0x172   : > { %816 = vperm.xlu1 %2068, %v2529_v6   ;;  %v2859_v49 = vpop.permute.xlu1 %668  ;;  %v966_v6 = vld [vmem:[%s3133_s2 + $0x78] sm:$0xff] }
 0x176   : > { %2069 = vset.pattern.permute.xlu1 %v2167_v8  ;;  %v716_v8 = vmul.f32 %v2582_v31, %v2797_v43  ;;  %v912_v43 = vmul.f32 %v2599_v59, %v857_v25  ;;  %v1244_v25 = vld [vmem:[%s3135_s4 + $0x28] sm:$0xff] }
 0x177   : > { %1050 = vperm.xlu1 %2069, %v964_v58   ;;  %v416_v24 = vpop.permute.xlu1 %415  ;;  %v1151_v58 = vadd.f32 %v1026_v30, %v927_v40 }
 0x178   : > { %v537_v4 = vmul.f32 %v2586_v32, %v416_v24  ;;  %v748_v50 = vadd.f32 %v716_v8, %v552_v60  ;;  %v1545_v8 = vld [vmem:[%s3137_s6 + $0x8] sm:$0xff] }
 0x179   : > { %v1690_v60 = vld [vmem:[%s3138_s7 + $0x8] sm:$0xff] }
 0x17a   : > { %v944_v2 = vadd.f32 %v912_v43, %v748_v50  ;;  %v506_v43 = vpop.permute.xlu0 %505 }
 0x17b   : > { %1140 = vperm.xlu1 %2069, %v982_v12  }
 0x17c   : > { %v601_v54 = vpop.permute.xlu1 %600  ;;  %v1168_v28 = vadd.f32 %v1111_v41, %v944_v2  ;;  %v718_v2 = vmul.f32 %v2582_v31, %v2859_v49  ;;  %v1692_v49 = vld [vmem:[%s3138_s7 + $0x18] sm:$0xff] }
 0x17d   : > { %v701_v17 = vmul.f32 %v2582_v31, %v601_v54  ;;  %v1183_v54 = vmax.f32 %v1151_v58, 0.0 }
 0x17e   : > { %v1200_v61 = vmax.f32 %v1168_v28, 0.0  ;;  %v554_v28 = vmul.f32 %v2586_v32, %v2856_v15  ;;  %v1693_v15 = vld [vmem:[%s3138_s7 + $0x20] sm:$0xff] }
 0x17f   : > { %v2877_v56 = vadd.f32 %v701_v17, %v537_v4  ;;  %1060 = vperm.xlu1 %2069, %v966_v6   ;;  %v1254_v4 = vld [vmem:[%s3135_s4 + $0x78] sm:$0xff] }
 0x180   : > { %v2879_v45 = vpop.permute.xlu1 %604 }
 0x181   : > { %v702_v22 = vmul.f32 %v2582_v31, %v2879_v45 }
 0x183   : > { %1262 = vperm.xlu1 %2069, %v1240_v33  }
 0x185   : > { %v2898_v10 = vpop.permute.xlu1 %864 }
 0x187   : > { %1272 = vperm.xlu1 %2069, %v1242_v38  }
 0x18a   : > { %v1106_v3 = vpop.permute.xlu1 %1105 }
 0x18b   : > { %v1167_v14 = vadd.f32 %v1106_v3, %v943_v7  ;;  %1282 = vperm.xlu1 %2069, %v1244_v25   ;;  %v717_v25 = vmul.f32 %v2582_v31, %v2474_v51  ;;  %v553_v7 = vmul.f32 %v2586_v32, %v2868_v42  ;;  %v914_v3 = vmul.f32 %v2599_v59, %v2898_v10 }
 0x18c   : > { %v913_v51 = vmul.f32 %v2599_v59, %v2552_v16 }
 0x18d   : > { %v1199_v46 = vmax.f32 %v1167_v14, 0.0  ;;  %v2972_v14 = vpop.permute.xlu0 %430  ;;  %v749_v0 = vadd.f32 %v717_v25, %v553_v7  ;;  %v915_v7 = vmul.f32 %v2599_v59, %v2559_v20 }
 0x18f   : > { %v1235_v47 = vpack.c.bf16 %v1200_v61, %v1199_v46  ;;  %1292 = vperm.xlu1 %2069, %v1246_v11   ;;  %v2915_v62 = vpop.permute.xlu1 %796  ;;  %v750_v11 = vadd.f32 %v718_v2, %v554_v28  ;;  %v945_v53 = vadd.f32 %v913_v51, %v749_v0 }
 0x190   : > { %v897_v27 = vmul.f32 %v2599_v59, %v2915_v62 }
 0x191   : > { %1879 = vmatprep.subr.bf16.mxu0 %v1235_v47  ;;  %v946_v46 = vadd.f32 %v914_v3, %v750_v11  ;;  %v1121_v61 = vpop.permute.xlu0 %1120 }
 0x192   : > { %v929_v30 = vadd.f32 %v897_v27, %v2877_v56 }
 0x193   : > { %1302 = vperm.xlu1 %2069, %v1248_v18   ;;  %v2926_v36 = vpop.permute.xlu1 %800  ;;  %v1170_v10 = vadd.f32 %v1121_v61, %v946_v46 }
 0x195   : > { %v1202_v16 = vmax.f32 %v1170_v10, 0.0 }
 0x197   : > { %1312 = vperm.xlu1 %2069, %v1250_v34   ;;  %v538_v34 = vmul.f32 %v2586_v32, %v2891_v52 }
 0x198   : > { %v1031_v24 = vpop.permute.xlu1 %1030 }
 0x199   : > { %v1152_v12 = vadd.f32 %v1031_v24, %v928_v37  ;;  %v898_v37 = vmul.f32 %v2599_v59, %v2926_v36  ;;  %v734_v24 = vadd.f32 %v702_v22, %v538_v34 }
 0x19b   : > { %v1184_v13 = vmax.f32 %v1152_v12, 0.0  ;;  %1322 = vperm.xlu1 %2069, %v1252_v44   ;;  %v1036_v44 = vpop.permute.xlu0 %1035  ;;  %v930_v62 = vadd.f32 %v898_v37, %v734_v24 }
 0x19c   : > { %v2934_v6 = vpop.permute.xlu1 %510  ;;  %v1153_v12 = vadd.f32 %v1036_v44, %v929_v30 }
 0x19d   : > { %v1227_v17 = vpack.c.bf16 %v1184_v13, %v1183_v54 }
 0x19f   : > { %1332 = vperm.xlu1 %2069, %v1254_v4   ;;  %1880 = vmatpush3.bf16.msra.mxu0 %v1227_v17  ;;  %v1185_v4 = vmax.f32 %v1153_v12, 0.0 }
 0x1a1   : > { %v2942_v33 = vpop.permute.xlu1 %676 }
 0x1a2   : > { %v720_v56 = vmul.f32 %v2582_v31, %v2942_v33 }
 0x1a3   : > { %1559 = vperm.xlu1 %2069, %v1545_v8  }
 0x1a6   : > { %v426_v29 = vpop.permute.xlu1 %425 }
 0x1a7   : > { %1569 = vperm.xlu1 %2069, %v1547_v35   ;;  %v539_v38 = vmul.f32 %v2586_v32, %v426_v29  ;;  %v516_v29 = vpop.permute.xlu0 %515 }
 0x1ab   : > { %1704 = vperm.xlu1 %2069, %v1690_v60   ;;  %v609_v50 = vpop.permute.xlu1 %608  ;;  %v441_v2 = vpop.permute.xlu0 %440 }
 0x1ac   : > { %v703_v63 = vmul.f32 %v2582_v31, %v609_v50  ;;  %v719_v50 = vmul.f32 %v2582_v31, %v2485_v55 }
 0x1ae   : > { %v2957_v9 = vadd.f32 %v703_v63, %v539_v38  ;;  %v555_v38 = vmul.f32 %v2586_v32, %v506_v43  ;;  %v556_v63 = vmul.f32 %v2586_v32, %v2934_v6 }
 0x1af   : > { %1709 = vperm.xlu1 %2069, %v1691_v48   ;;  %v2959_v41 = vpop.permute.xlu1 %612  ;;  %v1131_v33 = vpop.permute.xlu0 %1130 }
 0x1b0   : > { %v752_v25 = vadd.f32 %v720_v56, %v556_v63  ;;  %v751_v28 = vadd.f32 %v719_v50, %v555_v38  ;;  %v704_v10 = vmul.f32 %v2582_v31, %v2959_v41 }
 0x1b2   : > { %v947_v51 = vadd.f32 %v915_v7, %v751_v28  ;;  %v2073_v28 = vld [vmem:[%s3134_s3 + $0x14] ss:$8 sps:$4 sm:$0xff]  }
 0x1b3   : > { %1714 = vperm.xlu1 %2069, %v1692_v49   ;;  %v1046_v20 = vpop.permute.xlu0 %1045 }
 0x1b4   : > { %v873_v42 = vpop.permute.xlu1 %872 }
 0x1b5   : > { %v916_v48 = vmul.f32 %v2599_v59, %v873_v42  ;;  %v557_v42 = vmul.f32 %v2586_v32, %v516_v29 }
 0x1b7   : > { %1719 = vperm.xlu1 %2069, %v1693_v15   ;;  %v948_v3 = vadd.f32 %v916_v48, %v752_v25 }
 0x1b9   : > { %v1116_v47 = vpop.permute.xlu1 %1115  ;;  %v1172_v11 = vadd.f32 %v1131_v33, %v948_v3  ;;  %v2075_v3 = vld [vmem:[%s3134_s3 + $0x10] ss:$8 sps:$4 sm:$0xff]   ;;  %v2078_v33 = vld [vmem:[%s3134_s3 + $0x20] ss:$8 sps:$4 sm:$0xff]  }
 0x1ba   : > { %v1169_v18 = vadd.f32 %v1116_v47, %v945_v53  ;;  %v721_v53 = vmul.f32 %v2582_v31, %v2491_v57  ;;  %v1136_v57 = vpop.permute.xlu0 %1135 }
 0x1bb   : > { %1724 = vperm.xlu1 %2069, %v1694_v5   ;;  %v1204_v43 = vmax.f32 %v1172_v11, 0.0  ;;  %v540_v5 = vmul.f32 %v2586_v32, %v2972_v14  ;;  %v2079_v11 = vld [vmem:[%s3134_s3 + $0x34] ss:$8 sps:$4 sm:$0xff]  }
 0x1bc   : > { %v1201_v39 = vmax.f32 %v1169_v18, 0.0 }
 0x1bd   : > { %v736_v27 = vadd.f32 %v704_v10, %v540_v5  ;;  %v2094_v10 = vld [vmem:[%s3136_s5] sm:$0xff]  }
 0x1be   : > { %v1236_v40 = vpack.c.bf16 %v1202_v16, %v1201_v39  ;;  %v805_v19 = vpop.permute.xlu1 %804  ;;  %v917_v16 = vmul.f32 %v2599_v59, %v2570_v23  ;;  %v1056_v56 = vpop.permute.xlu0 %1055  ;;  %1963 = vmatprep.mubr.bf16.mxu1 %v2094_v10 }
 0x1bf   : > { %1734 = vperm.xlu1 %2069, %v1696_v1   ;;  %v899_v15 = vmul.f32 %v2599_v59, %v805_v19  ;;  %v753_v1 = vadd.f32 %v721_v53, %v557_v42  ;;  %v2093_v42 = vld [vmem:[%s3134_s3 + $0x70] ss:$8 sps:$4 sm:$0xff]  }
 0x1c0   : > { %1881 = vmatprep.subr.bf16.mxu0 %v1236_v40 }
 0x1c1   : > { %v931_v47 = vadd.f32 %v899_v15, %v2957_v9  ;;  %v949_v37 = vadd.f32 %v917_v16, %v753_v1  ;;  %v2088_v15 = vld [vmem:[%s3134_s3 + $0x64] ss:$8 sps:$4 sm:$0xff]  }
 0x1c2   : > { %v809_v58 = vpop.permute.xlu1 %808 }
 0x1c3   : > { %v900_v18 = vmul.f32 %v2599_v59, %v809_v58  ;;  %v1155_v19 = vadd.f32 %v1046_v20, %v931_v47 }
 0x1c5   : > { %v932_v34 = vadd.f32 %v900_v18, %v736_v27  ;;  %v1258_v18 = vpop.permute.xlu0 %1257 }
 0x1c7   : > { %v1041_v54 = vpop.permute.xlu1 %1040 }
 0x1c8   : > { %v1154_v13 = vadd.f32 %v1041_v54, %v930_v62  ;;  %v542_v62 = vmul.f32 %v2586_v32, %v441_v2  ;;  %v1173_v54 = vadd.f32 %v1136_v57, %v949_v37 }
 0x1ca   : > { %v1186_v17 = vmax.f32 %v1154_v13, 0.0  ;;  %v1187_v13 = vmax.f32 %v1155_v19, 0.0  ;;  %v1205_v50 = vmax.f32 %v1173_v54, 0.0 }
 0x1cb   : > { %v521_v8 = vpop.permute.xlu1 %520 }
 0x1cc   : > { %v1228_v52 = vpack.c.bf16 %v1186_v17, %v1185_v4  ;;  %v558_v22 = vmul.f32 %v2586_v32, %v521_v8 }
 0x1ce   : > { %1882 = vmatpush3.bf16.msra.mxu0 %v1228_v52 }
 0x1d0   : > { %v685_v35 = vpop.permute.xlu1 %684 }
 0x1d1   : > { %v722_v41 = vmul.f32 %v2582_v31, %v685_v35 }
 0x1d3   : > { %v754_v23 = vadd.f32 %v722_v41, %v558_v22 }
 0x1d5   : > { %v436_v45 = vpop.permute.xlu1 %435 }
 0x1d6   : > { %v541_v14 = vmul.f32 %v2586_v32, %v436_v45 }
 0x1da   : > { %v617_v60 = vpop.permute.xlu1 %616 }
 0x1db   : > { %v705_v40 = vmul.f32 %v2582_v31, %v617_v60 }
 0x1dd   : > { %v737_v24 = vadd.f32 %v705_v40, %v541_v14 }
 0x1de   : > { %v621_v36 = vpop.permute.xlu1 %620 }
 0x1df   : > { %v706_v44 = vmul.f32 %v2582_v31, %v621_v36 }
 0x1e1   : > { %v738_v45 = vadd.f32 %v706_v44, %v542_v62 }
 0x1e3   : > { %v881_v49 = vpop.permute.xlu1 %880 }
 0x1e4   : > { %v918_v9 = vmul.f32 %v2599_v59, %v881_v49  ;;  %v2076_v49 = vld [vmem:[%s3134_s3 + $0x24] ss:$8 sps:$4 sm:$0xff]  }
 0x1e6   : > { %v950_v52 = vadd.f32 %v918_v9, %v754_v23 }
 0x1e8   : > { %v1126_v0 = vpop.permute.xlu1 %1125 }
 0x1e9   : > { %v1171_v55 = vadd.f32 %v1126_v0, %v947_v51  ;;  %v2081_v51 = vld [vmem:[%s3134_s3 + $0x30] ss:$8 sps:$4 sm:$0xff]   ;;  %v2082_v0 = vld [vmem:[%s3134_s3 + $0x44] ss:$8 sps:$4 sm:$0xff]  }
 0x1eb   : > { %v1203_v46 = vmax.f32 %v1171_v55, 0.0  ;;  %v2084_v55 = vld [vmem:[%s3134_s3 + $0x40] ss:$8 sps:$4 sm:$0xff]  }
 0x1ed   : > { %v1237_v6 = vpack.c.bf16 %v1204_v43, %v1203_v46  ;;  %v813_v61 = vpop.permute.xlu1 %812  ;;  %v2085_v46 = vld [vmem:[%s3134_s3 + $0x54] ss:$8 sps:$4 sm:$0xff]   ;;  %v2087_v43 = vld [vmem:[%s3134_s3 + $0x50] ss:$8 sps:$4 sm:$0xff]  }
 0x1ee   : > { %v901_v30 = vmul.f32 %v2599_v59, %v813_v61  ;;  %v2091_v61 = vld [vmem:[%s3134_s3 + $0x74] ss:$8 sps:$4 sm:$0xff]  }
 0x1ef   : > { %1883 = vmatprep.subr.bf16.mxu0 %v1237_v6  ;;  %v2090_v6 = vld [vmem:[%s3134_s3 + $0x60] ss:$8 sps:$4 sm:$0xff]  }
 0x1f0   : > { %v933_v4 = vadd.f32 %v901_v30, %v737_v24  ;;  %v1268_v30 = vpop.permute.xlu0 %1267 }
 0x1f1   : > { %v817_v39 = vpop.permute.xlu1 %816 }
 0x1f2   : > { %v902_v17 = vmul.f32 %v2599_v59, %v817_v39  ;;  %v1157_v38 = vadd.f32 %v1056_v56, %v933_v4  ;;  %v2070_v59 = vld [vmem:[%s3134_s3] ss:$8 sps:$4 sm:$0xff]  }
 0x1f4   : > { %v934_v31 = vadd.f32 %v902_v17, %v738_v45  ;;  %v1189_v2 = vmax.f32 %v1157_v38, 0.0 }
 0x1f6   : > { %v1051_v58 = vpop.permute.xlu1 %1050 }
 0x1f7   : > { %v1156_v12 = vadd.f32 %v1051_v58, %v932_v34 }
 0x1f9   : > { %v1188_v8 = vmax.f32 %v1156_v12, 0.0 }
 0x1fa   : > { %v1141_v35 = vpop.permute.xlu1 %1140 }
 0x1fb   : > { %v1229_v29 = vpack.c.bf16 %v1188_v8, %v1187_v13  ;;  %v1174_v60 = vadd.f32 %v1141_v35, %v950_v52  ;;  %v1278_v52 = vpop.permute.xlu0 %1277 }
 0x1fd   : > { %v1206_v63 = vmax.f32 %v1174_v60, 0.0  ;;  %1884 = vmatpush3.bf16.msra.mxu0 %v1229_v29 }
 0x1fe   : > { %v1061_v36 = vpop.permute.xlu1 %1060 }
 0x1ff   : > { %v1238_v48 = vpack.c.bf16 %v1206_v63, %v1205_v50  ;;  %v1158_v32 = vadd.f32 %v1061_v36, %v934_v31 }
 0x201   : > { %v1190_v25 = vmax.f32 %v1158_v32, 0.0  ;;  %1885 = vmatprep.subr.bf16.mxu0 %v1238_v48 }
 0x202   : > { %v1263_v27 = vpop.permute.xlu1 %1262 }
 0x203   : > { %v1230_v7 = vpack.c.bf16 %v1190_v25, %v1189_v2  ;;  %v1288_v2 = vpop.permute.xlu0 %1287 }
 0x205   : > { %1886 = vmatpush3.bf16.msra.mxu0 %v1230_v7 }
 0x206   : > { %v1273_v24 = vpop.permute.xlu1 %1272 }
 0x208   : > { %1448 = vmatmul.mubr.bf16.vlgmr.msra.gmra.mrb[0].mxu0 %v2070_v59 }
 0x209   : > { %1455 = vmatprep.mubr.bf16.mxu0 %v2073_v28 }
 0x20a   : > { %v1283_v60 = vpop.permute.xlu1 %1282 }
 0x20e   : > { %v1293_v28 = vpop.permute.xlu1 %1292 }
 0x210   : > { %1456 = vmatmul.mubr.bf16.gmra.mrb[4].mxu0 %v2075_v3 }
 0x211   : > { %1463 = vmatprep.mubr.bf16.mxu0 %v2076_v49 }
 0x218   : > { %1464 = vmatmul.mubr.bf16.gmra.mrb[8].mxu0 %v2078_v33 }
 0x219   : > { %1471 = vmatprep.mubr.bf16.mxu0 %v2079_v11 }
 0x220   : > { %1472 = vmatmul.mubr.bf16.gmra.mrb[12].mxu0 %v2081_v51 }
 0x221   : > { %1479 = vmatprep.mubr.bf16.mxu0 %v2082_v0 }
 0x228   : > { %1480 = vmatmul.mubr.bf16.gmra.mrb[16].mxu0 %v2084_v55 }
 0x229   : > { %1487 = vmatprep.mubr.bf16.mxu0 %v2085_v46 }
 0x230   : > { %1488 = vmatmul.mubr.bf16.gmra.mrb[20].mxu0 %v2087_v43  ;;  %v1298_v43 = vpop.permute.xlu0 %1297 }
 0x231   : > { %1495 = vmatprep.mubr.bf16.mxu0 %v2088_v15 }
 0x238   : > { %1496 = vmatmul.mubr.bf16.gmra.mrb[24].mxu0 %v2090_v6 }
 0x239   : > { %1503 = vmatprep.mubr.bf16.mxu0 %v2091_v61 }
 0x240   : > { %1504 = vmatmul.mubr.bf16.gmra.mrb[28].mxu0 %v2093_v42  ;;  %v1303_v42 = vpop.permute.xlu1 %1302 }
 0x2db   : > { %v1887_v20 = vpop.f32.mrb[0].mxu0 }
 0x2dc   : > { %v1888_v53 = vpop.f32.mrb[1].mxu0 }
 0x2dd   : > { %v1889_v5 = vadd.f32 %v1888_v53, %v1887_v20  ;;  %v1890_v47 = vpop.f32.mrb[2].mxu0 }
 0x2de   : > { %v1891_v39 = vpop.f32.mrb[3].mxu0 }
 0x2df   : > { %v1450_v16 = vadd.f32 %v1889_v5, %v1258_v18  ;;  %v1892_v1 = vadd.f32 %v1891_v39, %v1890_v47 }
 0x2e1   : > { %v1453_v41 = vadd.f32 %v1892_v1, %v1263_v27  ;;  %v1512_v40 = vmax.f32 %v1450_v16, 0.0  ;;  %v1308_v1 = vpop.permute.xlu0 %1307 }
 0x2e3   : > { %v1513_v19 = vmax.f32 %v1453_v41, 0.0  ;;  %v1893_v34 = vpop.f32.mrb[4].mxu0 }
 0x2e4   : > { %v1894_v57 = vpop.f32.mrb[5].mxu0 }
 0x2e5   : > { %v1895_v22 = vadd.f32 %v1894_v57, %v1893_v34  ;;  %v1896_v14 = vpop.f32.mrb[6].mxu0  ;;  %v1536_v9 = vpack.c.bf16 %v1513_v19, %v1512_v40  ;;  %v1313_v19 = vpop.permute.xlu1 %1312 }
 0x2e6   : > { %v1897_v37 = vpop.f32.mrb[7].mxu0 }
 0x2e7   : > { %v1458_v58 = vadd.f32 %v1895_v22, %v1268_v30  ;;  %v1898_v23 = vadd.f32 %v1897_v37, %v1896_v14  ;;  %1947 = vmatprep.subr.bf16.mxu1 %v1536_v9 }
 0x2e8   : > { %1948 = vmatpush3.bf16.msra.mxu1 %v1536_v9 }
 0x2e9   : > { %v1461_v44 = vadd.f32 %v1898_v23, %v1273_v24  ;;  %v1514_v12 = vmax.f32 %v1458_v58, 0.0  ;;  %v1318_v23 = vpop.permute.xlu0 %1317 }
 0x2eb   : > { %v1515_v62 = vmax.f32 %v1461_v44, 0.0  ;;  %v1899_v54 = vpop.f32.mrb[8].mxu0 }
 0x2ec   : > { %v1900_v13 = vpop.f32.mrb[9].mxu0 }
 0x2ed   : > { %v1901_v4 = vadd.f32 %v1900_v13, %v1899_v54  ;;  %v1902_v17 = vpop.f32.mrb[10].mxu0  ;;  %v1537_v8 = vpack.c.bf16 %v1515_v62, %v1514_v12  ;;  %v1323_v62 = vpop.permute.xlu1 %1322 }
 0x2ee   : > { %v1903_v35 = vpop.f32.mrb[11].mxu0 }
 0x2ef   : > { %v1466_v45 = vadd.f32 %v1901_v4, %v1278_v52  ;;  %v1904_v29 = vadd.f32 %v1903_v35, %v1902_v17  ;;  %1949 = vmatprep.subr.bf16.mxu1 %v1537_v8 }
 0x2f0   : > { %1950 = vmatpush3.bf16.msra.mxu1 %v1537_v8 }
 0x2f1   : > { %v1469_v56 = vadd.f32 %v1904_v29, %v1283_v60  ;;  %v1516_v50 = vmax.f32 %v1466_v45, 0.0  ;;  %v1328_v29 = vpop.permute.xlu0 %1327 }
 0x2f3   : > { %v1517_v38 = vmax.f32 %v1469_v56, 0.0  ;;  %v1905_v63 = vpop.f32.mrb[12].mxu0 }
 0x2f4   : > { %v1906_v31 = vpop.f32.mrb[13].mxu0 }
 0x2f5   : > { %v1907_v36 = vadd.f32 %v1906_v31, %v1905_v63  ;;  %v1908_v48 = vpop.f32.mrb[14].mxu0  ;;  %v1538_v32 = vpack.c.bf16 %v1517_v38, %v1516_v50  ;;  %v1333_v38 = vpop.permute.xlu1 %1332 }
 0x2f6   : > { %v1909_v25 = vpop.f32.mrb[15].mxu0 }
 0x2f7   : > { %v1474_v7 = vadd.f32 %v1907_v36, %v1288_v2  ;;  %v1910_v59 = vadd.f32 %v1909_v25, %v1908_v48  ;;  %1951 = vmatprep.subr.bf16.mxu1 %v1538_v32  ;;  %v2096_v2 = vld [vmem:[%s3136_s5 + $0x10] sm:$0xff]   ;;  %v2097_v25 = vld [vmem:[%s3136_s5 + $0x18] sm:$0xff]  }
 0x2f8   : > { %1952 = vmatpush3.bf16.msra.mxu1 %v1538_v32  ;;  %v2095_v32 = vld [vmem:[%s3136_s5 + $0x8] sm:$0xff]  }
 0x2f9   : > { %v1477_v3 = vadd.f32 %v1910_v59, %v1293_v28  ;;  %v1518_v49 = vmax.f32 %v1474_v7, 0.0  ;;  %v1555_v7 = vpop.permute.xlu0 %1554  ;;  %v1560_v59 = vpop.permute.xlu1 %1559 }
 0x2fb   : > { %v1519_v33 = vmax.f32 %v1477_v3, 0.0  ;;  %v1911_v11 = vpop.f32.mrb[16].mxu0 }
 0x2fc   : > { %v1912_v51 = vpop.f32.mrb[17].mxu0 }
 0x2fd   : > { %v1913_v0 = vadd.f32 %v1912_v51, %v1911_v11  ;;  %v1914_v55 = vpop.f32.mrb[18].mxu0  ;;  %v1539_v46 = vpack.c.bf16 %v1519_v33, %v1518_v49  ;;  %v1565_v28 = vpop.permute.xlu0 %1564 }
 0x2fe   : > { %v1915_v15 = vpop.f32.mrb[19].mxu0  ;;  %v1570_v3 = vpop.permute.xlu1 %1569 }
 0x2ff   : > { %v1482_v6 = vadd.f32 %v1913_v0, %v1298_v43  ;;  %v1916_v61 = vadd.f32 %v1915_v15, %v1914_v55  ;;  %1953 = vmatprep.subr.bf16.mxu1 %v1539_v46 }
 0x300   : > { %1954 = vmatpush3.bf16.msra.mxu1 %v1539_v46 }
 0x301   : > { %v1485_v10 = vadd.f32 %v1916_v61, %v1303_v42  ;;  %v1520_v20 = vmax.f32 %v1482_v6, 0.0  ;;  %v1700_v49 = vpop.permute.xlu0 %1699 }
 0x302   : > { %v1705_v33 = vpop.permute.xlu1 %1704 }
 0x303   : > { %v1521_v53 = vmax.f32 %v1485_v10, 0.0  ;;  %v1917_v5 = vpop.f32.mrb[20].mxu0 }
 0x304   : > { %v1918_v47 = vpop.f32.mrb[21].mxu0 }
 0x305   : > { %v1919_v18 = vadd.f32 %v1918_v47, %v1917_v5  ;;  %v1920_v39 = vpop.f32.mrb[22].mxu0  ;;  %v1540_v16 = vpack.c.bf16 %v1521_v53, %v1520_v20  ;;  %v1575_v11 = vpop.permute.xlu0 %1574 }
 0x306   : > { %v1921_v27 = vpop.f32.mrb[23].mxu0  ;;  %v1710_v51 = vpop.permute.xlu1 %1709 }
 0x307   : > { %v1490_v41 = vadd.f32 %v1919_v18, %v1308_v1  ;;  %v1922_v40 = vadd.f32 %v1921_v27, %v1920_v39  ;;  %1955 = vmatprep.subr.bf16.mxu1 %v1540_v16 }
 0x308   : > { %1956 = vmatpush3.bf16.msra.mxu1 %v1540_v16 }
 0x309   : > { %v1493_v34 = vadd.f32 %v1922_v40, %v1313_v19  ;;  %v1522_v57 = vmax.f32 %v1490_v41, 0.0  ;;  %v1580_v0 = vpop.permute.xlu0 %1579 }
 0x30a   : > { %v1715_v46 = vpop.permute.xlu1 %1714 }
 0x30b   : > { %v1523_v22 = vmax.f32 %v1493_v34, 0.0  ;;  %v1923_v14 = vpop.f32.mrb[24].mxu0 }
 0x30c   : > { %v1924_v9 = vpop.f32.mrb[25].mxu0 }
 0x30d   : > { %v1925_v30 = vadd.f32 %v1924_v9, %v1923_v14  ;;  %v1926_v37 = vpop.f32.mrb[26].mxu0  ;;  %v1541_v58 = vpack.c.bf16 %v1523_v22, %v1522_v57  ;;  %v1585_v5 = vpop.permute.xlu0 %1584 }
 0x30e   : > { %v1927_v24 = vpop.f32.mrb[27].mxu0  ;;  %v1720_v39 = vpop.permute.xlu1 %1719 }
 0x30f   : > { %v1498_v44 = vadd.f32 %v1925_v30, %v1318_v23  ;;  %v1928_v12 = vadd.f32 %v1927_v24, %v1926_v37  ;;  %1957 = vmatprep.subr.bf16.mxu1 %v1541_v58 }
 0x310   : > { %1958 = vmatpush3.bf16.msra.mxu1 %v1541_v58 }
 0x311   : > { %v1501_v54 = vadd.f32 %v1928_v12, %v1323_v62  ;;  %v1524_v13 = vmax.f32 %v1498_v44, 0.0  ;;  %v1590_v9 = vpop.permute.xlu0 %1589 }
 0x312   : > { %v1725_v12 = vpop.permute.xlu1 %1724 }
 0x313   : > { %v1525_v4 = vmax.f32 %v1501_v54, 0.0  ;;  %v1929_v17 = vpop.f32.mrb[28].mxu0 }
 0x314   : > { %v1930_v8 = vpop.f32.mrb[29].mxu0 }
 0x315   : > { %v1931_v52 = vadd.f32 %v1930_v8, %v1929_v17  ;;  %v1932_v35 = vpop.f32.mrb[30].mxu0  ;;  %v1542_v45 = vpack.c.bf16 %v1525_v4, %v1524_v13 }
 0x316   : > { %v1933_v60 = vpop.f32.mrb[31].mxu0 }
 0x317   : > { %v1506_v56 = vadd.f32 %v1931_v52, %v1328_v29  ;;  %v1934_v50 = vadd.f32 %v1933_v60, %v1932_v35  ;;  %1959 = vmatprep.subr.bf16.mxu1 %v1542_v45  ;;  %v1730_v35 = vpop.permute.xlu0 %1729  ;;  %v1735_v60 = vpop.permute.xlu1 %1734 }
 0x318   : > { %1960 = vmatpush3.bf16.msra.mxu1 %v1542_v45 }
 0x319   : > { %v1509_v63 = vadd.f32 %v1934_v50, %v1333_v38  ;;  %v1526_v31 = vmax.f32 %v1506_v56, 0.0 }
 0x31b   : > { %v1527_v36 = vmax.f32 %v1509_v63, 0.0 }
 0x31d   : > { %v1543_v48 = vpack.c.bf16 %v1527_v36, %v1526_v31 }
 0x31f   : > { %1961 = vmatprep.subr.bf16.mxu1 %v1543_v48 }
 0x320   : > { %1962 = vmatpush3.bf16.msra.mxu1 %v1543_v48 }
 0x323   : > { %1964 = vmatmul.mubr.bf16.vlgmr.msra.gmra.mrb[0].mxu1 %v2095_v32  ;;  %v1762_v32 = vpop.permute.xlu0 %1761 }
 0x324   : > { %1967 = vmatprep.mubr.bf16.mxu1 %v2096_v2 }
 0x32b   : > { %1968 = vmatmul.mubr.bf16.gmra.mrb[4].mxu1 %v2097_v25  ;;  %v1767_v25 = vrot.slane %v1762_v32, %v525_v26 }
 0x3f6   : > { %v1965_v55 = vpop.f32.mrb[0].mxu1 }
 0x3f7   : > { %v1650_v43 = vpop.f32.mrb[1].mxu1  ;;  %v1659_v15 = vadd.f32 %v1965_v55, %v1565_v28 }
 0x3f8   : > { %v1651_v6 = vadd.f32 %v1650_v43, %v1555_v7  ;;  %v1966_v61 = vpop.f32.mrb[2].mxu1 }
 0x3f9   : > { %v1662_v42 = vadd.f32 %v1966_v61, %v1570_v3  ;;  %v1653_v10 = vpop.f32.mrb[3].mxu1  ;;  %v1683_v47 = vmax.f32 %v1659_v15, 0.0 }
 0x3fa   : > { %v1681_v20 = vmax.f32 %v1651_v6, 0.0  ;;  %v1654_v53 = vadd.f32 %v1653_v10, %v1560_v59 }
 0x3fb   : > { %v1684_v16 = vmax.f32 %v1662_v42, 0.0  ;;  %v1739_v19 = vmul.f32 %v1710_v51, %v1683_v47 }
 0x3fc   : > { %v1682_v18 = vmax.f32 %v1654_v53, 0.0  ;;  %v1737_v1 = vmul.f32 %v1700_v49, %v1681_v20 }
 0x3fd   : > { %v1740_v30 = vmul.f32 %v1715_v46, %v1684_v16 }
 0x3fe   : > { %v1738_v27 = vmul.f32 %v1705_v33, %v1682_v18  ;;  %v1969_v41 = vpop.f32.mrb[4].mxu1 }
 0x3ff   : > { %v1666_v40 = vpop.f32.mrb[5].mxu1  ;;  %v1675_v57 = vadd.f32 %v1969_v41, %v1585_v5 }
 0x400   : > { %v1745_v34 = vadd.f32 %v1738_v27, %v1737_v1  ;;  %v1667_v22 = vadd.f32 %v1666_v40, %v1575_v11  ;;  %v1970_v14 = vpop.f32.mrb[6].mxu1 }
 0x401   : > { %v1669_v37 = vpop.f32.mrb[7].mxu1  ;;  %v1678_v24 = vadd.f32 %v1970_v14, %v1590_v9  ;;  %v1687_v62 = vmax.f32 %v1675_v57, 0.0 }
 0x402   : > { %v1746_v58 = vadd.f32 %v1745_v34, %v1739_v19  ;;  %v1685_v23 = vmax.f32 %v1667_v22, 0.0  ;;  %v1670_v44 = vadd.f32 %v1669_v37, %v1580_v0 }
 0x403   : > { %v1688_v8 = vmax.f32 %v1678_v24, 0.0  ;;  %v1743_v45 = vmul.f32 %v1730_v35, %v1687_v62 }
 0x404   : > { %v1741_v54 = vmul.f32 %v1720_v39, %v1685_v23  ;;  %v1747_v13 = vadd.f32 %v1746_v58, %v1740_v30  ;;  %v1686_v4 = vmax.f32 %v1670_v44, 0.0 }
 0x405   : > { %v1744_v56 = vmul.f32 %v1735_v60, %v1688_v8 }
 0x406   : > { %v1748_v17 = vadd.f32 %v1747_v13, %v1741_v54  ;;  %v1742_v52 = vmul.f32 %v1725_v12, %v1686_v4 }
 0x408   : > { %v1749_v29 = vadd.f32 %v1748_v17, %v1742_v52 }
 0x40a   : > { %v1750_v50 = vadd.f32 %v1749_v29, %v1743_v45 }
 0x40c   : > { %v1751_v38 = vadd.f32 %v1750_v50, %v1744_v56 }
 0x40e   : > { %v1752_v63 = vrot.slane %v1751_v38, 4 }
 0x410   : > { %v1753_v31 = vadd.f32 %v1752_v63, %v1751_v38 }
 0x412   : > { %v1754_v36 = vrot.slane %v1753_v31, 2 }
 0x414   : > { %v1755_v48 = vadd.f32 %v1754_v36, %v1753_v31 }
 0x416   : > { %v1756_v2 = vrot.slane %v1755_v48, 1 }
 0x418   : > { %v1757_v7 = vadd.f32 %v1756_v2, %v1755_v48 }
 0x41a   : > { %v1768_v59 = vadd.f32 %v1767_v25, %v1757_v7 }
 0x41c   : > { %v1769_v28 = vsub.f32 0.0, %v1768_v59 }
 0x41e   : > { %v1770_v3 = vmul.f32 1.442695, %v1769_v28 }
 0x420   : > { %2098 = vpow2.f32 %v1770_v3 }
 0x42a   : > { %v2099_v49 = vpop.eup %2098 }
 0x42b   : > { %v1772_v33 = vadd.f32 1.0, %v2099_v49 }
 0x42d   : > { %2100 = vrcp.f32 %v1772_v33 }
 0x437   : > { %v2101_v21 = vpop.eup %2100 }
 0x438   : > { %1774 = vst [vmem:[%s324_s27] sm:$0x1] %v2101_v21 }
 0x439   : > { %2115 = shalt.err (!%p2112_p3)
}
 0x43a   : > { %s2116_s23 = scalar_lea.hbm %s3089_s10, 16  ;;  %s2120_s26 = scalar_lea.hbm %s3140_s9, 32 }
 0x43b   : > { %p2117_p4 = scmp.ne.s32.totalorder %s3089_s10, %s2116_s23  ;;  %p2121_p9 = scmp.lt.u32.totalorder %s3089_s10, %s3140_s9 }
 0x43c   : > { %p2122_p10 = scmp.lt.u32.totalorder %s2120_s26, %s2116_s23  ;;  %p2124_p12 = scmp.lt.u32.totalorder %s2116_s23, %s3089_s10 }
 0x43d   : > { %p2118_p7 = pnand %p2117_p4, %p2261_p5 }
 0x43e   : > { %p2123_p11 = por %p2122_p10, %p2121_p9 }
 0x43f   : > { %p2119_p8 = pneg %p2118_p7 }
 0x440   : > { %p2125_p13 = por %p2124_p12, %p2123_p11 }
 0x442   : > { %p2126_p0 = pnand %p2125_p13, %p2119_p8 }
 0x444   : > { %2129 = shalt.err (!%p2126_p0)
}
 0x445   : > { %1971 = dma.vmem_to_hbm [thread:$0]  (%p2261_p5), %s3091_s28, 16, %s3089_s10, %s1776_s15  }
 0x446 PF: > { %p1977_p1 = scmp.ge.s32.totalorder %s2164_s14, 2  ;;  %s1800_s30 = sand.u32 1, %s2152_s11  }
 0x447   : > { %s1801_s17 = scalar_lea.sflag [#allocation4], %s1800_s30 }
 0x448   : > { %p1974_p2 = pnand %p1977_p1, %p2265_p6 }
 0x44a   : > { %2147 = dma.done.wait (!%p1974_p2), %s1801_s17, 16  }
 0x44b   : > { %2149 = vsyncadd (!%p1974_p2), %s1801_s17, 4294967280  ;;  %p21_p3 = scmp.ge.s32.totalorder %s2248_s16, 4   ;;  %s3143_s11 = smov %s2156_s12 }
 0x44c   : > { %s3144_s12 = smov %s2160_s13  ;;  %s3145_s13 = smov %s2259_s19 }
 0x44d   : > { %s3146_s14 = smov %s2248_s16  ;;  %23 = sbr.rel (!%p21_p3) target bundleno = 6 (0x6), region = 91 }
 0x454   :  { %1805 = vsyncpa [#allocation4], 1 }
 0x455   :  { %1807 = vsyncpa [#allocation4 + $0x1], 1 }

</bundles_post_ra>
